<compile_context>
chip_gen: v7x
topology: tpu7x:2x2x1
jax: 0.10.0
libtpu: 0.0.40
codegen_flags: <defaults>
</compile_context>

<pallas_src>
import functools
import math

import jax
import jax.numpy as jnp
from jax.experimental import pallas as pl
from jax.experimental.pallas import tpu as pltpu

_SQRT_HALF = 1.0 / math.sqrt(2.0)


def _round_up(x, m):
    return ((x + m - 1) // m) * m


# ---------------------------------------------------------------------------
# in-kernel math helpers (exp / rsqrt / arithmetic only -> clean lowering)
# ---------------------------------------------------------------------------
def _erf(x):
    # Abramowitz & Stegun 7.1.26 (|err| < ~1e-4 with approx recip) -> GELU.
    a1, a2, a3, a4, a5 = (0.254829592, -0.284496736, 1.421413741,
                          -1.453152027, 1.061405429)
    p = 0.3275911
    sign = jnp.where(x >= 0.0, 1.0, -1.0)
    ax = jnp.abs(x)
    t = pl.reciprocal(1.0 + p * ax, approx=True)        # EUP slot, not VALU
    poly = ((((a5 * t + a4) * t + a3) * t + a2) * t + a1) * t
    return sign * (1.0 - poly * jnp.exp(-ax * ax))


def _gelu(x):
    # torch.nn.GELU() default (erf-based)
    return 0.5 * x * (1.0 + _erf(x * _SQRT_HALF))


def _elu(x):
    # torch.nn.ELU(alpha=1.0)
    return jnp.where(x > 0.0, x, jnp.exp(x) - 1.0)


def _layernorm_noaff(x, eps=1e-5):
    # affine (gamma/beta) is folded into the following matmul at prep time
    mu = jnp.mean(x, axis=-1, keepdims=True)
    xc = x - mu
    var = jnp.mean(xc * xc, axis=-1, keepdims=True)
    return xc * jax.lax.rsqrt(var + eps)


def _softmax(x):
    m = jnp.max(x, axis=-1, keepdims=True)
    e = jnp.exp(x - m)
    return e * pl.reciprocal(jnp.sum(e, axis=-1, keepdims=True), approx=True)


def _full_spec(arr):
    nd = arr.ndim
    return pl.BlockSpec(arr.shape, lambda *g, _nd=nd: (0,) * _nd)


# ---------------------------------------------------------------------------
# Kernel 1: per-pathway SNN blocks, `block_p` pathways per grid step.
#   SNN_Block = Linear -> ELU -> AlphaDropout (identity at inference)
#   Output written directly in (B, P, H) layout (no host transpose), bf16.
# ---------------------------------------------------------------------------
def _snn_kernel(x_ref, w1_ref, b1_ref, w2_ref, b2_ref, o_ref, *, block_p):
    for i in range(block_p):                               # static unroll
        h = jnp.dot(x_ref[i], w1_ref[i],
                    preferred_element_type=jnp.float32) + b1_ref[i]
        h = _elu(h)
        h = jnp.dot(h.astype(jnp.bfloat16), w2_ref[i],
                    preferred_element_type=jnp.float32) + b2_ref[i]
        h = _elu(h)
        o_ref[:, i, :] = h.astype(o_ref.dtype)


def pallas_snn_all(x_stack, w1, b1, w2, b2, *, block_p=8):
    """x_stack: (Pp, B, K) bf16 (zero padded); returns (B, Pp, H) bf16."""
    Pp, B, K = x_stack.shape
    H = w1.shape[2]
    assert Pp % block_p == 0
    return pl.pallas_call(
        functools.partial(_snn_kernel, block_p=block_p),
        grid=(Pp // block_p,),
        in_specs=[pl.BlockSpec((block_p, B, K), lambda p: (p, 0, 0)),
                  pl.BlockSpec((block_p, K, H), lambda p: (p, 0, 0)),
                  pl.BlockSpec((block_p, 1, H), lambda p: (p, 0, 0)),
                  pl.BlockSpec((block_p, H, H), lambda p: (p, 0, 0)),
                  pl.BlockSpec((block_p, 1, H), lambda p: (p, 0, 0))],
        out_specs=pl.BlockSpec((B, block_p, H), lambda p: (0, p, 0)),
        out_shape=jax.ShapeDtypeStruct((B, Pp, H), jnp.bfloat16),
        compiler_params=pltpu.CompilerParams(dimension_semantics=("parallel",)),
    )(x_stack, w1, b1, w2, b2)


# ---------------------------------------------------------------------------
# Kernel 2: histology projection Linear, tiled over the flattened token axis.
#   Rows padded internally to a multiple of block_m (no partial edge tiles).
# ---------------------------------------------------------------------------
def _proj_kernel(x_ref, w_ref, b_ref, o_ref):
    acc = jnp.dot(x_ref[...].astype(jnp.bfloat16), w_ref[...],
                  preferred_element_type=jnp.float32) + b_ref[...]
    o_ref[...] = acc.astype(o_ref.dtype)


def pallas_linear_tiled(x, w_bf16, b_row, *, block_m=512, out_dtype=jnp.bfloat16):
    """y = x @ w + b; x: (..., K) f32, w: (K, N) bf16, b: (1, N) f32 -> bf16."""
    lead = x.shape[:-1]
    K = x.shape[-1]
    N = w_bf16.shape[1]
    M = int(math.prod(lead)) if lead else 1
    x2 = x.reshape(M, K)
    if M <= block_m:
        bm, Mp = M, M
    else:
        bm = block_m
        Mp = _round_up(M, bm)
        if Mp != M:
            x2 = jnp.pad(x2, ((0, Mp - M), (0, 0)))
    out = pl.pallas_call(
        _proj_kernel,
        grid=(Mp // bm,),
        in_specs=[pl.BlockSpec((bm, K), lambda i: (i, 0)),
                  pl.BlockSpec(w_bf16.shape, lambda i: (0, 0)),
                  pl.BlockSpec(b_row.shape, lambda i: (0, 0))],
        out_specs=pl.BlockSpec((bm, N), lambda i: (i, 0)),
        out_shape=jax.ShapeDtypeStruct((Mp, N), out_dtype),
        compiler_params=pltpu.CompilerParams(
            dimension_semantics=("parallel",),
            vmem_limit_bytes=32 * 1024 * 1024),
    )(x2, w_bf16, b_row)
    if Mp != M:
        out = out[:M]
    return out.reshape(lead + (N,))


# ---------------------------------------------------------------------------
# Kernel 3 (fused, flash-style M-tiled):
#   pre-LN -> fused QKV -> partial cross-attention -> FeedForward -> final LN
#   -> per-modality mean-pool -> classifier.
# Partial attention ('partial' attn_mode):
#   pathway queries attend to ALL tokens (P->P, P->H)  -> online softmax over
#     histology key tiles, seeded with the P->P block,
#   histology queries attend ONLY to pathway tokens (H->P) -> independent per
#     tile, FFN'd and mean-pool-accumulated per tile.
# All LN affines / the q-scale are folded into the weights at prep time.
# ---------------------------------------------------------------------------
def _coattn_ffn_pool_kernel(tok_omic_ref, tok_path_ref, wqkv_ref, bqkv_ref,
                            ffw1_ref, ffb1_ref, ffw2_ref, ffb2_ref,
                            wc_ref, bc_ref, o_ref,
                            qp_s, kp_s, vp_s, m_s, l_s, acc_s, hsum_s,
                            *, num_pathways, p_pad, dim_head,
                            m_total, m_padded, m_tile):
    mt = pl.program_id(1)
    dh = dim_head
    contract_last = (((1,), (1,)), ((), ()))
    pkey_valid = jax.lax.broadcasted_iota(jnp.int32, (1, p_pad), 1) < num_pathways

    def ffn_ln(z):
        # FeedForward (ff-LN affine folded into ffw1) + the coattn-Sequential's
        # final LayerNorm (affine folded into the classifier).
        h = _layernorm_noaff(z)
        h = jnp.dot(h.astype(jnp.bfloat16), ffw1_ref[...],
                    preferred_element_type=jnp.float32) + ffb1_ref[...]
        h = _gelu(h)
        h = jnp.dot(h.astype(jnp.bfloat16), ffw2_ref[...],
                    preferred_element_type=jnp.float32) + ffb2_ref[...]
        return _layernorm_noaff(h)

    # ---- first M-tile of each batch row: pathway QKV + P->P softmax seed ----
    @pl.when(mt == 0)
    def _init():
        xo = tok_omic_ref[0].astype(jnp.float32)                  # (P_pad, D)
        qkv = jnp.dot(_layernorm_noaff(xo).astype(jnp.bfloat16), wqkv_ref[...],
                      preferred_element_type=jnp.float32) + bqkv_ref[...]
        q_p = qkv[:, :dh].astype(jnp.bfloat16)                    # scale folded
        k_p = qkv[:, dh:2 * dh].astype(jnp.bfloat16)
        v_p = qkv[:, 2 * dh:].astype(jnp.bfloat16)
        qp_s[...] = q_p
        kp_s[...] = k_p
        vp_s[...] = v_p
        s_pp = jax.lax.dot_general(q_p, k_p, contract_last,
                                   preferred_element_type=jnp.float32)
        if p_pad > num_pathways:
            s_pp = jnp.where(pkey_valid, s_pp, -1e30)
        m0 = jnp.max(s_pp, axis=-1, keepdims=True)
        e0 = jnp.exp(s_pp - m0)
        m_s[...] = m0
        l_s[...] = jnp.sum(e0, axis=-1, keepdims=True)
        acc_s[...] = jnp.dot(e0.astype(jnp.bfloat16), v_p,
                             preferred_element_type=jnp.float32)
        hsum_s[...] = jnp.zeros_like(hsum_s)

    # ---- histology tile: LN -> fused QKV ----
    xh = tok_path_ref[0].astype(jnp.float32)                      # (Mt, D)
    qkv_h = jnp.dot(_layernorm_noaff(xh).astype(jnp.bfloat16), wqkv_ref[...],
                    preferred_element_type=jnp.float32) + bqkv_ref[...]
    q_h = qkv_h[:, :dh].astype(jnp.bfloat16)
    k_h = qkv_h[:, dh:2 * dh].astype(jnp.bfloat16)
    v_h = qkv_h[:, 2 * dh:].astype(jnp.bfloat16)

    # ---- pathway queries vs. this tile's histology keys (online softmax) ----
    s_ph = jax.lax.dot_general(qp_s[...], k_h, contract_last,
                               preferred_element_type=jnp.float32)  # (P_pad, Mt)
    if m_padded > m_total:
        hkey_valid = (mt * m_tile
                      + jax.lax.broadcasted_iota(jnp.int32, (1, m_tile), 1)) < m_total
        s_ph = jnp.where(hkey_valid, s_ph, -1e30)
    m_new = jnp.maximum(m_s[...], jnp.max(s_ph, axis=-1, keepdims=True))
    alpha = jnp.exp(m_s[...] - m_new)
    p_ph = jnp.exp(s_ph - m_new)
    l_s[...] = alpha * l_s[...] + jnp.sum(p_ph, axis=-1, keepdims=True)
    acc_s[...] = alpha * acc_s[...] + jnp.dot(p_ph.astype(jnp.bfloat16), v_h,
                                              preferred_element_type=jnp.float32)
    m_s[...] = m_new

    # ---- histology queries vs. pathway keys + FFN + mean-pool accumulate ----
    s_hp = jax.lax.dot_general(q_h, kp_s[...], contract_last,
                               preferred_element_type=jnp.float32)  # (Mt, P_pad)
    if p_pad > num_pathways:
        s_hp = jnp.where(pkey_valid, s_hp, -1e30)
    out_h = jnp.dot(_softmax(s_hp).astype(jnp.bfloat16), vp_s[...],
                    preferred_element_type=jnp.float32)             # (Mt, dh)
    h_h = ffn_ln(out_h)
    if m_padded > m_total:
        hrow_valid = (mt * m_tile
                      + jax.lax.broadcasted_iota(jnp.int32, (m_tile, 1), 0)) < m_total
        h_h = jnp.where(hrow_valid, h_h, 0.0)
    hsum_s[...] = hsum_s[...] + jnp.sum(h_h, axis=0, keepdims=True)

    # ---- finalize: pathway branch FFN, pooling, classifier ----
    @pl.when(mt == pl.num_programs(1) - 1)
    def _final():
        out_p = acc_s[...] * pl.reciprocal(l_s[...], approx=True)   # (P_pad, dh)
        h_p = ffn_ln(out_p)
        if p_pad > num_pathways:
            prow_valid = (jax.lax.broadcasted_iota(jnp.int32, (p_pad, 1), 0)
                          < num_pathways)
            h_p = jnp.where(prow_valid, h_p, 0.0)
        emb_p = jnp.sum(h_p, axis=0, keepdims=True) * (1.0 / num_pathways)
        emb_h = hsum_s[...] * (1.0 / m_total)
        emb = jnp.concatenate([emb_p, emb_h], axis=-1)              # (1, 2*dh)
        o_ref[0] = jnp.dot(emb, wc_ref[...],
                           preferred_element_type=jnp.float32) + bc_ref[...]


def pallas_coattn_ffn_classify(h_omic, h_path, prep, *, num_tokens_h, m_tile):
    """h_omic: (B, P_pad, D) bf16 (zero padded), h_path: (B, M_pad, D) bf16."""
    B, p_pad, D = h_omic.shape
    _, m_padded, _ = h_path.shape
    dh = prep["dim_head"]
    C = prep["wc"].shape[1]
    num_mt = m_padded // m_tile
    args = (h_omic, h_path, prep["wqkv"], prep["bqkv"],
            prep["ff_w1"], prep["ff_b1"], prep["ff_w2"], prep["ff_b2"],
            prep["wc"], prep["bc"])
    in_specs = [pl.BlockSpec((1, p_pad, D), lambda b, m: (b, 0, 0)),
                pl.BlockSpec((1, m_tile, D), lambda b, m: (b, m, 0))] + \
               [_full_spec(a) for a in args[2:]]
    # TODO(synk): on v7x (2 TCs) with B=1, split the M-tiles into 2 parallel
    # chunks with separate online-softmax states merged afterwards.
    out = pl.pallas_call(
        functools.partial(_coattn_ffn_pool_kernel,
                          num_pathways=prep["num_pathways"], p_pad=p_pad,
                          dim_head=dh, m_total=num_tokens_h,
                          m_padded=m_padded, m_tile=m_tile),
        grid=(B, num_mt),
        in_specs=in_specs,
        out_specs=pl.BlockSpec((1, 1, C), lambda b, m: (b, 0, 0)),
        out_shape=jax.ShapeDtypeStruct((B, 1, C), jnp.float32),
        scratch_shapes=[pltpu.VMEM((p_pad, dh), jnp.bfloat16),   # q_p (scaled)
                        pltpu.VMEM((p_pad, dh), jnp.bfloat16),   # k_p
                        pltpu.VMEM((p_pad, dh), jnp.bfloat16),   # v_p
                        pltpu.VMEM((p_pad, 1), jnp.float32),     # m
                        pltpu.VMEM((p_pad, 1), jnp.float32),     # l
                        pltpu.VMEM((p_pad, dh), jnp.float32),    # acc
                        pltpu.VMEM((1, dh), jnp.float32)],       # hist pool sum
        compiler_params=pltpu.CompilerParams(
            dimension_semantics=("parallel", "arbitrary"),
            vmem_limit_bytes=48 * 1024 * 1024),
    )(*args)
    return out.reshape(B, C)


# ---------------------------------------------------------------------------
# Parameter initialization (PyTorch-Linear-style uniform init) + one-time prep
# ---------------------------------------------------------------------------
def _init_linear(key, fan_in, fan_out, bias=True):
    kw, kb = jax.random.split(key)
    bound = 1.0 / math.sqrt(fan_in)
    w = jax.random.uniform(kw, (fan_in, fan_out), jnp.float32, -bound, bound)
    b = (jax.random.uniform(kb, (fan_out,), jnp.float32, -bound, bound)
         if bias else None)
    return w, b


def init_survpath_params(key, omic_sizes, path_dim, path_proj_dim, num_classes):
    hidden = path_proj_dim        # SNN hidden_dim (== path_proj_dim, ref cfg)
    out_dim = path_proj_dim // 2  # attention dim_head / post-attention dim
    keys = list(jax.random.split(key, 2 * len(omic_sizes) + 16))
    pop = lambda: keys.pop()

    params = {}
    params["sig_networks"] = [
        (_init_linear(pop(), osz, hidden), _init_linear(pop(), hidden, hidden))
        for osz in omic_sizes
    ]
    params["path_proj"] = _init_linear(pop(), path_dim, path_proj_dim)
    params["coattn_ln"] = (jnp.ones((path_proj_dim,), jnp.float32),
                           jnp.zeros((path_proj_dim,), jnp.float32))
    wq, _ = _init_linear(pop(), path_proj_dim, out_dim, bias=False)
    wk, _ = _init_linear(pop(), path_proj_dim, out_dim, bias=False)
    wv, _ = _init_linear(pop(), path_proj_dim, out_dim, bias=False)
    params["coattn_qkv"] = (wq, wk, wv)
    params["ff_ln"] = (jnp.ones((out_dim,), jnp.float32),
                       jnp.zeros((out_dim,), jnp.float32))
    params["ff_l1"] = _init_linear(pop(), out_dim, out_dim)
    params["ff_l2"] = _init_linear(pop(), out_dim, out_dim)
    params["post_ln"] = (jnp.ones((out_dim,), jnp.float32),
                         jnp.zeros((out_dim,), jnp.float32))
    params["classifier"] = _init_linear(pop(), 2 * out_dim, num_classes)
    return params


def prepare_params(params, omic_sizes, *, pathway_block=8, omic_k_align=128):
    """One-time weight prep: bucket+stack SNN weights (no Kmax padding), fuse
    QKV, fold LN affines / softmax scale into weights, bf16-cast matmul
    weights.  Keeps per-forward dispatch and HBM traffic minimal."""
    P = len(omic_sizes)
    hidden = params["sig_networks"][0][0][0].shape[1]

    # ---- bucket pathways by (128-aligned) omic width ----
    buckets = {}
    for i, k in enumerate(omic_sizes):
        kb = _round_up(max(int(k), omic_k_align), omic_k_align)
        buckets.setdefault(kb, []).append(i)
    snn_buckets, perm = [], []
    for kb in sorted(buckets):
        idxs = buckets[kb]
        perm.extend(idxs)
        n = len(idxs)
        n_pad = _round_up(n, pathway_block)
        w1 = jnp.zeros((n_pad, kb, hidden), jnp.bfloat16)
        b1 = jnp.zeros((n_pad, 1, hidden), jnp.float32)
        w2 = jnp.zeros((n_pad, hidden, hidden), jnp.bfloat16)
        b2 = jnp.zeros((n_pad, 1, hidden), jnp.float32)
        for j, i in enumerate(idxs):
            (w1i, b1i), (w2i, b2i) = params["sig_networks"][i]
            w1 = w1.at[j, :w1i.shape[0], :].set(w1i.astype(jnp.bfloat16))
            b1 = b1.at[j, 0, :].set(b1i)
            w2 = w2.at[j].set(w2i.astype(jnp.bfloat16))
            b2 = b2.at[j, 0, :].set(b2i)
        snn_buckets.append({"kb": kb, "idxs": tuple(idxs), "n": n,
                            "n_pad": n_pad, "w1": w1, "b1": b1,
                            "w2": w2, "b2": b2})
    inv_perm = [0] * P
    for pos, i in enumerate(perm):
        inv_perm[i] = pos

    pw, pb = params["path_proj"]
    lnw, lnb = params["coattn_ln"]
    wq, wk, wv = params["coattn_qkv"]
    flnw, flnb = params["ff_ln"]
    fw1, fb1 = params["ff_l1"]
    fw2, fb2 = params["ff_l2"]
    plnw, plnb = params["post_ln"]
    wc, bc = params["classifier"]

    dh = wq.shape[1]
    scale = dh ** -0.5
    # fold the softmax scale into wq, and the coattn pre-LN affine into wqkv
    wqkv = jnp.concatenate([wq * scale, wk, wv], axis=1)           # (D, 3*dh)
    wqkv_folded = (lnw[:, None] * wqkv).astype(jnp.bfloat16)
    bqkv = (lnb[None, :] @ wqkv).astype(jnp.float32)               # (1, 3*dh)
    # fold the FFN pre-LN affine into the first FFN linear
    ffw1 = (flnw[:, None] * fw1).astype(jnp.bfloat16)
    ffb1 = (flnb[None, :] @ fw1 + fb1[None, :]).astype(jnp.float32)
    # fold the final LayerNorm affine (commutes with mean-pool) into classifier
    g_cls = jnp.concatenate([plnw, plnw])
    b_cls = jnp.concatenate([plnb, plnb])
    wc_f = (g_cls[:, None] * wc).astype(jnp.float32)
    bc_f = (bc + b_cls @ wc).reshape(1, -1).astype(jnp.float32)

    return {
        "num_pathways": P,
        "num_pathways_padded": _round_up(P, 8),
        "pathway_block": pathway_block,
        "hidden": hidden,
        "dim_head": dh,
        "snn_buckets": snn_buckets,
        "perm": tuple(perm),
        "inv_perm": tuple(inv_perm),
        "proj_w": pw.astype(jnp.bfloat16), "proj_b": pb.reshape(1, -1),
        "wqkv": wqkv_folded, "bqkv": bqkv,
        "ff_w1": ffw1, "ff_b1": ffb1,
        "ff_w2": fw2.astype(jnp.bfloat16), "ff_b2": fb2.reshape(1, -1),
        "wc": wc_f, "bc": bc_f,
    }


# ---------------------------------------------------------------------------
# SurvPath.forward_no_loss
# ---------------------------------------------------------------------------
def survpath_forward(prep, x_path, x_omics, *, attn_m_tile=512):
    B = x_path.shape[0]
    P = prep["num_pathways"]
    P_pad = prep["num_pathways_padded"]

    # 1. per-pathway SNNs, bucketed by (128-aligned) omic width
    h_parts = []
    for bk in prep["snn_buckets"]:
        kb = bk["kb"]
        xs = [jnp.pad(x_omics[i].astype(jnp.float32),
                      ((0, 0), (0, kb - x_omics[i].shape[1]))).astype(jnp.bfloat16)
              for i in bk["idxs"]]
        x_stack = jnp.stack(xs, axis=0)                           # (n, B, kb)
        if bk["n_pad"] != bk["n"]:
            x_stack = jnp.pad(x_stack,
                              ((0, bk["n_pad"] - bk["n"]), (0, 0), (0, 0)))
        h = pallas_snn_all(x_stack, bk["w1"], bk["b1"], bk["w2"], bk["b2"],
                           block_p=prep["pathway_block"])         # (B,n_pad,H)
        h_parts.append(h[:, :bk["n"], :])
    h_omic = (jnp.concatenate(h_parts, axis=1)
              if len(h_parts) > 1 else h_parts[0])                # (B, P, H)
    if prep["perm"] != tuple(range(P)):                           # restore order
        h_omic = jnp.take(h_omic, jnp.asarray(prep["inv_perm"], jnp.int32),
                          axis=1)
    if P_pad != P:                                                # sublane align
        h_omic = jnp.pad(h_omic, ((0, 0), (0, P_pad - P), (0, 0)))

    # 2. histology token projection (M-tiled linear, bf16 activations out)
    h_path = pallas_linear_tiled(x_path.astype(jnp.float32),
                                 prep["proj_w"], prep["proj_b"])  # (B, M, D)
    M = h_path.shape[1]
    m_tile = min(attn_m_tile, _round_up(M, 8))
    M_pad = _round_up(M, m_tile)
    if M_pad != M:
        h_path = jnp.pad(h_path, ((0, 0), (0, M_pad - M), (0, 0)))

    # 3-6. fused: LN -> QKV -> partial cross-attn (flash M-tiled) -> FFN ->
    #       LN -> per-modality mean-pool -> classifier
    logits = pallas_coattn_ffn_classify(h_omic, h_path, prep,
                                        num_tokens_h=M, m_tile=m_tile)
    # TODO(synk): process_surv (loss / survival bookkeeping) not implemented;
    # forward returns logits only, matching forward_no_loss with loss_fn=None.
    return {"logits": logits}


# ---------------------------------------------------------------------------
# Plain-JAX reference (same math, f32) used as a numerical sanity check.
# ---------------------------------------------------------------------------
def reference_forward(params, x_path, x_omics, num_pathways):
    elu = lambda x: jnp.where(x > 0, x, jnp.exp(x) - 1.0)
    gelu = lambda x: 0.5 * x * (1.0 + jax.scipy.special.erf(x * _SQRT_HALF))

    def ln(x, w, b, eps=1e-5):
        mu = x.mean(-1, keepdims=True)
        var = ((x - mu) ** 2).mean(-1, keepdims=True)
        return (x - mu) / jnp.sqrt(var + eps) * w + b

    h_omic = []
    for (l1, l2), feat in zip(params["sig_networks"], x_omics):
        h = elu(feat.astype(jnp.float32) @ l1[0] + l1[1])
        h = elu(h @ l2[0] + l2[1])
        h_omic.append(h)
    h_omic = jnp.stack(h_omic, axis=1)
    pw, pb = params["path_proj"]
    tokens = jnp.concatenate([h_omic, x_path @ pw + pb], axis=1)

    lnw, lnb = params["coattn_ln"]
    xn = ln(tokens, lnw, lnb)
    wq, wk, wv = params["coattn_qkv"]
    dh = wq.shape[1]
    q, k, v = xn @ wq * dh ** -0.5, xn @ wk, xn @ wv
    p = num_pathways
    s_p = jnp.einsum('bqd,bkd->bqk', q[:, :p], k)
    out_p = jax.nn.softmax(s_p, axis=-1) @ v
    s_h = jnp.einsum('bqd,bkd->bqk', q[:, p:], k[:, :p])
    out_h = jax.nn.softmax(s_h, axis=-1) @ v[:, :p]
    attn = jnp.concatenate([out_p, out_h], axis=1)

    flnw, flnb = params["ff_ln"]
    w1, b1 = params["ff_l1"]
    w2, b2 = params["ff_l2"]
    plnw, plnb = params["post_ln"]
    h = gelu(ln(attn, flnw, flnb) @ w1 + b1) @ w2 + b2
    mm = ln(h, plnw, plnb)
    emb = jnp.concatenate([mm[:, :p].mean(1), mm[:, p:].mean(1)], axis=-1)
    wc, bc = params["classifier"]
    return emb @ wc + bc


if __name__ == "__main__":
    # scaled-down SurvPath config (reference: omic_sizes=[100..600],
    # path_dim=1024, path_proj_dim=256, num_classes=4).  The chosen omic
    # sizes exercise two K-buckets and a non-identity pathway permutation.
    omic_sizes = [200, 16, 24, 130]
    path_dim = 64
    path_proj_dim = 32
    num_classes = 4
    B = 2
    num_proto = 8            # number of histology prototypes per slide
    num_pathways = len(omic_sizes)

    key = jax.random.PRNGKey(0)
    k_param, k_path, *k_omics = jax.random.split(key, 2 + len(omic_sizes))
    params = init_survpath_params(k_param, omic_sizes, path_dim,
                                  path_proj_dim, num_classes)
    prep = prepare_params(params, omic_sizes)
    x_path = jax.random.normal(k_path, (B, num_proto, path_dim), jnp.float32)
    x_omics = [jax.random.normal(k, (B, osz), jnp.float32)
               for k, osz in zip(k_omics, omic_sizes)]

    out = survpath_forward(prep, x_path, x_omics)
    logits = jax.block_until_ready(out["logits"])
    assert logits.shape == (B, num_classes)
    assert bool(jnp.all(jnp.isfinite(logits)))

    ref_logits = reference_forward(params, x_path, x_omics, num_pathways)
    assert bool(jnp.allclose(logits, ref_logits, atol=1e-1, rtol=1e-1))
    print("KERNEL_OK")
</pallas_src>

<mosaic_0001>
module attributes {stable_mosaic.version = 11 : i64} {
  func.func @_snn_kernel(%arg0: i32, %arg1: memref<8x2x128xbf16, #tpu.memory_space<vmem>>, %arg2: memref<8x128x32xbf16, #tpu.memory_space<vmem>>, %arg3: memref<8x1x32xf32, #tpu.memory_space<vmem>>, %arg4: memref<8x32x32xbf16, #tpu.memory_space<vmem>>, %arg5: memref<8x1x32xf32, #tpu.memory_space<vmem>>, %arg6: memref<2x8x32xbf16, #tpu.memory_space<vmem>>) attributes {dimension_semantics = [#tpu.dimension_semantics<parallel>], iteration_bounds = array<i64: 1>, scalar_prefetch = 0 : i64, scratch_operands = 0 : i64, tpu.core_type = #tpu.core_type<tc>, window_params = [{transform_indices = @transform_0, window_bounds = array<i64: 8, 2, 128>}, {transform_indices = @transform_1, window_bounds = array<i64: 8, 128, 32>}, {transform_indices = @transform_2, window_bounds = array<i64: 8, 1, 32>}, {transform_indices = @transform_3, window_bounds = array<i64: 8, 32, 32>}, {transform_indices = @transform_4, window_bounds = array<i64: 8, 1, 32>}, {transform_indices = @transform_5, window_bounds = array<i64: 2, 8, 32>}]} {
    %c0 = arith.constant 0 : index
    %c0_0 = arith.constant 0 : index
    %c0_1 = arith.constant 0 : index
    %0 = vector.load %arg1[%c0, %c0_0, %c0_1] : memref<8x2x128xbf16, #tpu.memory_space<vmem>>, vector<1x2x128xbf16>
    %1 = vector.shape_cast %0 : vector<1x2x128xbf16> to vector<2x128xbf16>
    %c0_2 = arith.constant 0 : index
    %c0_3 = arith.constant 0 : index
    %c0_4 = arith.constant 0 : index
    %2 = vector.load %arg2[%c0_2, %c0_3, %c0_4] : memref<8x128x32xbf16, #tpu.memory_space<vmem>>, vector<1x128x32xbf16>
    %3 = vector.shape_cast %2 : vector<1x128x32xbf16> to vector<128x32xbf16>
    %cst = arith.constant dense<0.000000e+00> : vector<2x32xf32>
    %4 = tpu.matmul %1, %3, %cst {dimension_numbers = #tpu.dot_dimension_numbers<[1], [0], [0], [1], [0, 0, 1, 1], [], []>} : vector<2x128xbf16>, vector<128x32xbf16>, vector<2x32xf32> -> vector<2x32xf32>
    %c0_5 = arith.constant 0 : index
    %c0_6 = arith.constant 0 : index
    %c0_7 = arith.constant 0 : index
    %5 = vector.load %arg3[%c0_5, %c0_6, %c0_7] : memref<8x1x32xf32, #tpu.memory_space<vmem>>, vector<1x1x32xf32>
    %6 = vector.shape_cast %5 : vector<1x1x32xf32> to vector<1x32xf32>
    %7 = vector.broadcast %6 : vector<1x32xf32> to vector<2x32xf32>
    %8 = arith.addf %4, %7 : vector<2x32xf32>
    %cst_8 = arith.constant 0.000000e+00 : f32
    %9 = vector.broadcast %cst_8 : f32 to vector<2x32xf32>
    %10 = arith.cmpf ogt, %8, %9 : vector<2x32xf32>
    %11 = math.exp %8 : vector<2x32xf32>
    %cst_9 = arith.constant 1.000000e+00 : f32
    %12 = vector.broadcast %cst_9 : f32 to vector<2x32xf32>
    %13 = arith.subf %11, %12 : vector<2x32xf32>
    %14 = arith.select %10, %8, %13 : vector<2x32xi1>, vector<2x32xf32>
    %15 = arith.truncf %14 : vector<2x32xf32> to vector<2x32xbf16>
    %c0_10 = arith.constant 0 : index
    %c0_11 = arith.constant 0 : index
    %c0_12 = arith.constant 0 : index
    %16 = vector.load %arg4[%c0_10, %c0_11, %c0_12] : memref<8x32x32xbf16, #tpu.memory_space<vmem>>, vector<1x32x32xbf16>
    %17 = vector.shape_cast %16 : vector<1x32x32xbf16> to vector<32x32xbf16>
    %cst_13 = arith.constant dense<0.000000e+00> : vector<2x32xf32>
    %18 = tpu.matmul %15, %17, %cst_13 {dimension_numbers = #tpu.dot_dimension_numbers<[1], [0], [0], [1], [0, 0, 1, 1], [], []>} : vector<2x32xbf16>, vector<32x32xbf16>, vector<2x32xf32> -> vector<2x32xf32>
    %c0_14 = arith.constant 0 : index
    %c0_15 = arith.constant 0 : index
    %c0_16 = arith.constant 0 : index
    %19 = vector.load %arg5[%c0_14, %c0_15, %c0_16] : memref<8x1x32xf32, #tpu.memory_space<vmem>>, vector<1x1x32xf32>
    %20 = vector.shape_cast %19 : vector<1x1x32xf32> to vector<1x32xf32>
    %21 = vector.broadcast %20 : vector<1x32xf32> to vector<2x32xf32>
    %22 = arith.addf %18, %21 : vector<2x32xf32>
    %cst_17 = arith.constant 0.000000e+00 : f32
    %23 = vector.broadcast %cst_17 : f32 to vector<2x32xf32>
    %24 = arith.cmpf ogt, %22, %23 : vector<2x32xf32>
    %25 = math.exp %22 : vector<2x32xf32>
    %cst_18 = arith.constant 1.000000e+00 : f32
    %26 = vector.broadcast %cst_18 : f32 to vector<2x32xf32>
    %27 = arith.subf %25, %26 : vector<2x32xf32>
    %28 = arith.select %24, %22, %27 : vector<2x32xi1>, vector<2x32xf32>
    %29 = arith.truncf %28 : vector<2x32xf32> to vector<2x32xbf16>
    %c0_19 = arith.constant 0 : index
    %c0_20 = arith.constant 0 : index
    %c0_21 = arith.constant 0 : index
    %30 = vector.load %arg6[%c0_19, %c0_20, %c0_21] : memref<2x8x32xbf16, #tpu.memory_space<vmem>>, vector<2x1x32xbf16>
    %31 = vector.shape_cast %30 : vector<2x1x32xbf16> to vector<2x32xbf16>
    %32 = vector.shape_cast %29 : vector<2x32xbf16> to vector<2x1x32xbf16>
    tpu.vector_store %arg6[%c0_19, %c0_20, %c0_21], %32 {strides = array<i32>} : memref<2x8x32xbf16, #tpu.memory_space<vmem>>, vector<2x1x32xbf16>,
    %c1 = arith.constant 1 : index
    %c0_22 = arith.constant 0 : index
    %c0_23 = arith.constant 0 : index
    %33 = vector.load %arg1[%c1, %c0_22, %c0_23] : memref<8x2x128xbf16, #tpu.memory_space<vmem>>, vector<1x2x128xbf16>
    %34 = vector.shape_cast %33 : vector<1x2x128xbf16> to vector<2x128xbf16>
    %c1_24 = arith.constant 1 : index
    %c0_25 = arith.constant 0 : index
    %c0_26 = arith.constant 0 : index
    %35 = vector.load %arg2[%c1_24, %c0_25, %c0_26] : memref<8x128x32xbf16, #tpu.memory_space<vmem>>, vector<1x128x32xbf16>
    %36 = vector.shape_cast %35 : vector<1x128x32xbf16> to vector<128x32xbf16>
    %cst_27 = arith.constant dense<0.000000e+00> : vector<2x32xf32>
    %37 = tpu.matmul %34, %36, %cst_27 {dimension_numbers = #tpu.dot_dimension_numbers<[1], [0], [0], [1], [0, 0, 1, 1], [], []>} : vector<2x128xbf16>, vector<128x32xbf16>, vector<2x32xf32> -> vector<2x32xf32>
    %c1_28 = arith.constant 1 : index
    %c0_29 = arith.constant 0 : index
    %c0_30 = arith.constant 0 : index
    %38 = vector.load %arg3[%c1_28, %c0_29, %c0_30] : memref<8x1x32xf32, #tpu.memory_space<vmem>>, vector<1x1x32xf32>
    %39 = vector.shape_cast %38 : vector<1x1x32xf32> to vector<1x32xf32>
    %40 = vector.broadcast %39 : vector<1x32xf32> to vector<2x32xf32>
    %41 = arith.addf %37, %40 : vector<2x32xf32>
    %cst_31 = arith.constant 0.000000e+00 : f32
    %42 = vector.broadcast %cst_31 : f32 to vector<2x32xf32>
    %43 = arith.cmpf ogt, %41, %42 : vector<2x32xf32>
    %44 = math.exp %41 : vector<2x32xf32>
    %cst_32 = arith.constant 1.000000e+00 : f32
    %45 = vector.broadcast %cst_32 : f32 to vector<2x32xf32>
    %46 = arith.subf %44, %45 : vector<2x32xf32>
    %47 = arith.select %43, %41, %46 : vector<2x32xi1>, vector<2x32xf32>
    %48 = arith.truncf %47 : vector<2x32xf32> to vector<2x32xbf16>
    %c1_33 = arith.constant 1 : index
    %c0_34 = arith.constant 0 : index
    %c0_35 = arith.constant 0 : index
    %49 = vector.load %arg4[%c1_33, %c0_34, %c0_35] : memref<8x32x32xbf16, #tpu.memory_space<vmem>>, vector<1x32x32xbf16>
    %50 = vector.shape_cast %49 : vector<1x32x32xbf16> to vector<32x32xbf16>
    %cst_36 = arith.constant dense<0.000000e+00> : vector<2x32xf32>
    %51 = tpu.matmul %48, %50, %cst_36 {dimension_numbers = #tpu.dot_dimension_numbers<[1], [0], [0], [1], [0, 0, 1, 1], [], []>} : vector<2x32xbf16>, vector<32x32xbf16>, vector<2x32xf32> -> vector<2x32xf32>
    %c1_37 = arith.constant 1 : index
    %c0_38 = arith.constant 0 : index
    %c0_39 = arith.constant 0 : index
    %52 = vector.load %arg5[%c1_37, %c0_38, %c0_39] : memref<8x1x32xf32, #tpu.memory_space<vmem>>, vector<1x1x32xf32>
    %53 = vector.shape_cast %52 : vector<1x1x32xf32> to vector<1x32xf32>
    %54 = vector.broadcast %53 : vector<1x32xf32> to vector<2x32xf32>
    %55 = arith.addf %51, %54 : vector<2x32xf32>
    %cst_40 = arith.constant 0.000000e+00 : f32
    %56 = vector.broadcast %cst_40 : f32 to vector<2x32xf32>
    %57 = arith.cmpf ogt, %55, %56 : vector<2x32xf32>
    %58 = math.exp %55 : vector<2x32xf32>
    %cst_41 = arith.constant 1.000000e+00 : f32
    %59 = vector.broadcast %cst_41 : f32 to vector<2x32xf32>
    %60 = arith.subf %58, %59 : vector<2x32xf32>
    %61 = arith.select %57, %55, %60 : vector<2x32xi1>, vector<2x32xf32>
    %62 = arith.truncf %61 : vector<2x32xf32> to vector<2x32xbf16>
    %c0_42 = arith.constant 0 : index
    %c1_43 = arith.constant 1 : index
    %c0_44 = arith.constant 0 : index
    %63 = vector.load %arg6[%c0_42, %c1_43, %c0_44] : memref<2x8x32xbf16, #tpu.memory_space<vmem>>, vector<2x1x32xbf16>
    %64 = vector.shape_cast %63 : vector<2x1x32xbf16> to vector<2x32xbf16>
    %65 = vector.shape_cast %62 : vector<2x32xbf16> to vector<2x1x32xbf16>
    tpu.vector_store %arg6[%c0_42, %c1_43, %c0_44], %65 {strides = array<i32>} : memref<2x8x32xbf16, #tpu.memory_space<vmem>>, vector<2x1x32xbf16>,
    %c2 = arith.constant 2 : index
    %c0_45 = arith.constant 0 : index
    %c0_46 = arith.constant 0 : index
    %66 = vector.load %arg1[%c2, %c0_45, %c0_46] : memref<8x2x128xbf16, #tpu.memory_space<vmem>>, vector<1x2x128xbf16>
    %67 = vector.shape_cast %66 : vector<1x2x128xbf16> to vector<2x128xbf16>
    %c2_47 = arith.constant 2 : index
    %c0_48 = arith.constant 0 : index
    %c0_49 = arith.constant 0 : index
    %68 = vector.load %arg2[%c2_47, %c0_48, %c0_49] : memref<8x128x32xbf16, #tpu.memory_space<vmem>>, vector<1x128x32xbf16>
    %69 = vector.shape_cast %68 : vector<1x128x32xbf16> to vector<128x32xbf16>
    %cst_50 = arith.constant dense<0.000000e+00> : vector<2x32xf32>
    %70 = tpu.matmul %67, %69, %cst_50 {dimension_numbers = #tpu.dot_dimension_numbers<[1], [0], [0], [1], [0, 0, 1, 1], [], []>} : vector<2x128xbf16>, vector<128x32xbf16>, vector<2x32xf32> -> vector<2x32xf32>
    %c2_51 = arith.constant 2 : index
    %c0_52 = arith.constant 0 : index
    %c0_53 = arith.constant 0 : index
    %71 = vector.load %arg3[%c2_51, %c0_52, %c0_53] : memref<8x1x32xf32, #tpu.memory_space<vmem>>, vector<1x1x32xf32>
    %72 = vector.shape_cast %71 : vector<1x1x32xf32> to vector<1x32xf32>
    %73 = vector.broadcast %72 : vector<1x32xf32> to vector<2x32xf32>
    %74 = arith.addf %70, %73 : vector<2x32xf32>
    %cst_54 = arith.constant 0.000000e+00 : f32
    %75 = vector.broadcast %cst_54 : f32 to vector<2x32xf32>
    %76 = arith.cmpf ogt, %74, %75 : vector<2x32xf32>
    %77 = math.exp %74 : vector<2x32xf32>
    %cst_55 = arith.constant 1.000000e+00 : f32
    %78 = vector.broadcast %cst_55 : f32 to vector<2x32xf32>
    %79 = arith.subf %77, %78 : vector<2x32xf32>
    %80 = arith.select %76, %74, %79 : vector<2x32xi1>, vector<2x32xf32>
    %81 = arith.truncf %80 : vector<2x32xf32> to vector<2x32xbf16>
    %c2_56 = arith.constant 2 : index
    %c0_57 = arith.constant 0 : index
    %c0_58 = arith.constant 0 : index
    %82 = vector.load %arg4[%c2_56, %c0_57, %c0_58] : memref<8x32x32xbf16, #tpu.memory_space<vmem>>, vector<1x32x32xbf16>
    %83 = vector.shape_cast %82 : vector<1x32x32xbf16> to vector<32x32xbf16>
    %cst_59 = arith.constant dense<0.000000e+00> : vector<2x32xf32>
    %84 = tpu.matmul %81, %83, %cst_59 {dimension_numbers = #tpu.dot_dimension_numbers<[1], [0], [0], [1], [0, 0, 1, 1], [], []>} : vector<2x32xbf16>, vector<32x32xbf16>, vector<2x32xf32> -> vector<2x32xf32>
    %c2_60 = arith.constant 2 : index
    %c0_61 = arith.constant 0 : index
    %c0_62 = arith.constant 0 : index
    %85 = vector.load %arg5[%c2_60, %c0_61, %c0_62] : memref<8x1x32xf32, #tpu.memory_space<vmem>>, vector<1x1x32xf32>
    %86 = vector.shape_cast %85 : vector<1x1x32xf32> to vector<1x32xf32>
    %87 = vector.broadcast %86 : vector<1x32xf32> to vector<2x32xf32>
    %88 = arith.addf %84, %87 : vector<2x32xf32>
    %cst_63 = arith.constant 0.000000e+00 : f32
    %89 = vector.broadcast %cst_63 : f32 to vector<2x32xf32>
    %90 = arith.cmpf ogt, %88, %89 : vector<2x32xf32>
    %91 = math.exp %88 : vector<2x32xf32>
    %cst_64 = arith.constant 1.000000e+00 : f32
    %92 = vector.broadcast %cst_64 : f32 to vector<2x32xf32>
    %93 = arith.subf %91, %92 : vector<2x32xf32>
    %94 = arith.select %90, %88, %93 : vector<2x32xi1>, vector<2x32xf32>
    %95 = arith.truncf %94 : vector<2x32xf32> to vector<2x32xbf16>
    %c0_65 = arith.constant 0 : index
    %c2_66 = arith.constant 2 : index
    %c0_67 = arith.constant 0 : index
    %96 = vector.load %arg6[%c0_65, %c2_66, %c0_67] : memref<2x8x32xbf16, #tpu.memory_space<vmem>>, vector<2x1x32xbf16>
    %97 = vector.shape_cast %96 : vector<2x1x32xbf16> to vector<2x32xbf16>
    %98 = vector.shape_cast %95 : vector<2x32xbf16> to vector<2x1x32xbf16>
    tpu.vector_store %arg6[%c0_65, %c2_66, %c0_67], %98 {strides = array<i32>} : memref<2x8x32xbf16, #tpu.memory_space<vmem>>, vector<2x1x32xbf16>,
    %c3 = arith.constant 3 : index
    %c0_68 = arith.constant 0 : index
    %c0_69 = arith.constant 0 : index
    %99 = vector.load %arg1[%c3, %c0_68, %c0_69] : memref<8x2x128xbf16, #tpu.memory_space<vmem>>, vector<1x2x128xbf16>
    %100 = vector.shape_cast %99 : vector<1x2x128xbf16> to vector<2x128xbf16>
    %c3_70 = arith.constant 3 : index
    %c0_71 = arith.constant 0 : index
    %c0_72 = arith.constant 0 : index
    %101 = vector.load %arg2[%c3_70, %c0_71, %c0_72] : memref<8x128x32xbf16, #tpu.memory_space<vmem>>, vector<1x128x32xbf16>
    %102 = vector.shape_cast %101 : vector<1x128x32xbf16> to vector<128x32xbf16>
    %cst_73 = arith.constant dense<0.000000e+00> : vector<2x32xf32>
    %103 = tpu.matmul %100, %102, %cst_73 {dimension_numbers = #tpu.dot_dimension_numbers<[1], [0], [0], [1], [0, 0, 1, 1], [], []>} : vector<2x128xbf16>, vector<128x32xbf16>, vector<2x32xf32> -> vector<2x32xf32>
    %c3_74 = arith.constant 3 : index
    %c0_75 = arith.constant 0 : index
    %c0_76 = arith.constant 0 : index
    %104 = vector.load %arg3[%c3_74, %c0_75, %c0_76] : memref<8x1x32xf32, #tpu.memory_space<vmem>>, vector<1x1x32xf32>
    %105 = vector.shape_cast %104 : vector<1x1x32xf32> to vector<1x32xf32>
    %106 = vector.broadcast %105 : vector<1x32xf32> to vector<2x32xf32>
    %107 = arith.addf %103, %106 : vector<2x32xf32>
    %cst_77 = arith.constant 0.000000e+00 : f32
    %108 = vector.broadcast %cst_77 : f32 to vector<2x32xf32>
    %109 = arith.cmpf ogt, %107, %108 : vector<2x32xf32>
    %110 = math.exp %107 : vector<2x32xf32>
    %cst_78 = arith.constant 1.000000e+00 : f32
    %111 = vector.broadcast %cst_78 : f32 to vector<2x32xf32>
    %112 = arith.subf %110, %111 : vector<2x32xf32>
    %113 = arith.select %109, %107, %112 : vector<2x32xi1>, vector<2x32xf32>
    %114 = arith.truncf %113 : vector<2x32xf32> to vector<2x32xbf16>
    %c3_79 = arith.constant 3 : index
    %c0_80 = arith.constant 0 : index
    %c0_81 = arith.constant 0 : index
    %115 = vector.load %arg4[%c3_79, %c0_80, %c0_81] : memref<8x32x32xbf16, #tpu.memory_space<vmem>>, vector<1x32x32xbf16>
    %116 = vector.shape_cast %115 : vector<1x32x32xbf16> to vector<32x32xbf16>
    %cst_82 = arith.constant dense<0.000000e+00> : vector<2x32xf32>
    %117 = tpu.matmul %114, %116, %cst_82 {dimension_numbers = #tpu.dot_dimension_numbers<[1], [0], [0], [1], [0, 0, 1, 1], [], []>} : vector<2x32xbf16>, vector<32x32xbf16>, vector<2x32xf32> -> vector<2x32xf32>
    %c3_83 = arith.constant 3 : index
    %c0_84 = arith.constant 0 : index
    %c0_85 = arith.constant 0 : index
    %118 = vector.load %arg5[%c3_83, %c0_84, %c0_85] : memref<8x1x32xf32, #tpu.memory_space<vmem>>, vector<1x1x32xf32>
    %119 = vector.shape_cast %118 : vector<1x1x32xf32> to vector<1x32xf32>
    %120 = vector.broadcast %119 : vector<1x32xf32> to vector<2x32xf32>
    %121 = arith.addf %117, %120 : vector<2x32xf32>
    %cst_86 = arith.constant 0.000000e+00 : f32
    %122 = vector.broadcast %cst_86 : f32 to vector<2x32xf32>
    %123 = arith.cmpf ogt, %121, %122 : vector<2x32xf32>
    %124 = math.exp %121 : vector<2x32xf32>
    %cst_87 = arith.constant 1.000000e+00 : f32
    %125 = vector.broadcast %cst_87 : f32 to vector<2x32xf32>
    %126 = arith.subf %124, %125 : vector<2x32xf32>
    %127 = arith.select %123, %121, %126 : vector<2x32xi1>, vector<2x32xf32>
    %128 = arith.truncf %127 : vector<2x32xf32> to vector<2x32xbf16>
    %c0_88 = arith.constant 0 : index
    %c3_89 = arith.constant 3 : index
    %c0_90 = arith.constant 0 : index
    %129 = vector.load %arg6[%c0_88, %c3_89, %c0_90] : memref<2x8x32xbf16, #tpu.memory_space<vmem>>, vector<2x1x32xbf16>
    %130 = vector.shape_cast %129 : vector<2x1x32xbf16> to vector<2x32xbf16>
    %131 = vector.shape_cast %128 : vector<2x32xbf16> to vector<2x1x32xbf16>
    tpu.vector_store %arg6[%c0_88, %c3_89, %c0_90], %131 {strides = array<i32>} : memref<2x8x32xbf16, #tpu.memory_space<vmem>>, vector<2x1x32xbf16>,
    %c4 = arith.constant 4 : index
    %c0_91 = arith.constant 0 : index
    %c0_92 = arith.constant 0 : index
    %132 = vector.load %arg1[%c4, %c0_91, %c0_92] : memref<8x2x128xbf16, #tpu.memory_space<vmem>>, vector<1x2x128xbf16>
    %133 = vector.shape_cast %132 : vector<1x2x128xbf16> to vector<2x128xbf16>
    %c4_93 = arith.constant 4 : index
    %c0_94 = arith.constant 0 : index
    %c0_95 = arith.constant 0 : index
    %134 = vector.load %arg2[%c4_93, %c0_94, %c0_95] : memref<8x128x32xbf16, #tpu.memory_space<vmem>>, vector<1x128x32xbf16>
    %135 = vector.shape_cast %134 : vector<1x128x32xbf16> to vector<128x32xbf16>
    %cst_96 = arith.constant dense<0.000000e+00> : vector<2x32xf32>
    %136 = tpu.matmul %133, %135, %cst_96 {dimension_numbers = #tpu.dot_dimension_numbers<[1], [0], [0], [1], [0, 0, 1, 1], [], []>} : vector<2x128xbf16>, vector<128x32xbf16>, vector<2x32xf32> -> vector<2x32xf32>
    %c4_97 = arith.constant 4 : index
    %c0_98 = arith.constant 0 : index
    %c0_99 = arith.constant 0 : index
    %137 = vector.load %arg3[%c4_97, %c0_98, %c0_99] : memref<8x1x32xf32, #tpu.memory_space<vmem>>, vector<1x1x32xf32>
    %138 = vector.shape_cast %137 : vector<1x1x32xf32> to vector<1x32xf32>
    %139 = vector.broadcast %138 : vector<1x32xf32> to vector<2x32xf32>
    %140 = arith.addf %136, %139 : vector<2x32xf32>
    %cst_100 = arith.constant 0.000000e+00 : f32
    %141 = vector.broadcast %cst_100 : f32 to vector<2x32xf32>
    %142 = arith.cmpf ogt, %140, %141 : vector<2x32xf32>
    %143 = math.exp %140 : vector<2x32xf32>
    %cst_101 = arith.constant 1.000000e+00 : f32
    %144 = vector.broadcast %cst_101 : f32 to vector<2x32xf32>
    %145 = arith.subf %143, %144 : vector<2x32xf32>
    %146 = arith.select %142, %140, %145 : vector<2x32xi1>, vector<2x32xf32>
    %147 = arith.truncf %146 : vector<2x32xf32> to vector<2x32xbf16>
    %c4_102 = arith.constant 4 : index
    %c0_103 = arith.constant 0 : index
    %c0_104 = arith.constant 0 : index
    %148 = vector.load %arg4[%c4_102, %c0_103, %c0_104] : memref<8x32x32xbf16, #tpu.memory_space<vmem>>, vector<1x32x32xbf16>
    %149 = vector.shape_cast %148 : vector<1x32x32xbf16> to vector<32x32xbf16>
    %cst_105 = arith.constant dense<0.000000e+00> : vector<2x32xf32>
    %150 = tpu.matmul %147, %149, %cst_105 {dimension_numbers = #tpu.dot_dimension_numbers<[1], [0], [0], [1], [0, 0, 1, 1], [], []>} : vector<2x32xbf16>, vector<32x32xbf16>, vector<2x32xf32> -> vector<2x32xf32>
    %c4_106 = arith.constant 4 : index
    %c0_107 = arith.constant 0 : index
    %c0_108 = arith.constant 0 : index
    %151 = vector.load %arg5[%c4_106, %c0_107, %c0_108] : memref<8x1x32xf32, #tpu.memory_space<vmem>>, vector<1x1x32xf32>
    %152 = vector.shape_cast %151 : vector<1x1x32xf32> to vector<1x32xf32>
    %153 = vector.broadcast %152 : vector<1x32xf32> to vector<2x32xf32>
    %154 = arith.addf %150, %153 : vector<2x32xf32>
    %cst_109 = arith.constant 0.000000e+00 : f32
    %155 = vector.broadcast %cst_109 : f32 to vector<2x32xf32>
    %156 = arith.cmpf ogt, %154, %155 : vector<2x32xf32>
    %157 = math.exp %154 : vector<2x32xf32>
    %cst_110 = arith.constant 1.000000e+00 : f32
    %158 = vector.broadcast %cst_110 : f32 to vector<2x32xf32>
    %159 = arith.subf %157, %158 : vector<2x32xf32>
    %160 = arith.select %156, %154, %159 : vector<2x32xi1>, vector<2x32xf32>
    %161 = arith.truncf %160 : vector<2x32xf32> to vector<2x32xbf16>
    %c0_111 = arith.constant 0 : index
    %c4_112 = arith.constant 4 : index
    %c0_113 = arith.constant 0 : index
    %162 = vector.load %arg6[%c0_111, %c4_112, %c0_113] : memref<2x8x32xbf16, #tpu.memory_space<vmem>>, vector<2x1x32xbf16>
    %163 = vector.shape_cast %162 : vector<2x1x32xbf16> to vector<2x32xbf16>
    %164 = vector.shape_cast %161 : vector<2x32xbf16> to vector<2x1x32xbf16>
    tpu.vector_store %arg6[%c0_111, %c4_112, %c0_113], %164 {strides = array<i32>} : memref<2x8x32xbf16, #tpu.memory_space<vmem>>, vector<2x1x32xbf16>,
    %c5 = arith.constant 5 : index
    %c0_114 = arith.constant 0 : index
    %c0_115 = arith.constant 0 : index
    %165 = vector.load %arg1[%c5, %c0_114, %c0_115] : memref<8x2x128xbf16, #tpu.memory_space<vmem>>, vector<1x2x128xbf16>
    %166 = vector.shape_cast %165 : vector<1x2x128xbf16> to vector<2x128xbf16>
    %c5_116 = arith.constant 5 : index
    %c0_117 = arith.constant 0 : index
    %c0_118 = arith.constant 0 : index
    %167 = vector.load %arg2[%c5_116, %c0_117, %c0_118] : memref<8x128x32xbf16, #tpu.memory_space<vmem>>, vector<1x128x32xbf16>
    %168 = vector.shape_cast %167 : vector<1x128x32xbf16> to vector<128x32xbf16>
    %cst_119 = arith.constant dense<0.000000e+00> : vector<2x32xf32>
    %169 = tpu.matmul %166, %168, %cst_119 {dimension_numbers = #tpu.dot_dimension_numbers<[1], [0], [0], [1], [0, 0, 1, 1], [], []>} : vector<2x128xbf16>, vector<128x32xbf16>, vector<2x32xf32> -> vector<2x32xf32>
    %c5_120 = arith.constant 5 : index
    %c0_121 = arith.constant 0 : index
    %c0_122 = arith.constant 0 : index
    %170 = vector.load %arg3[%c5_120, %c0_121, %c0_122] : memref<8x1x32xf32, #tpu.memory_space<vmem>>, vector<1x1x32xf32>
    %171 = vector.shape_cast %170 : vector<1x1x32xf32> to vector<1x32xf32>
    %172 = vector.broadcast %171 : vector<1x32xf32> to vector<2x32xf32>
    %173 = arith.addf %169, %172 : vector<2x32xf32>
    %cst_123 = arith.constant 0.000000e+00 : f32
    %174 = vector.broadcast %cst_123 : f32 to vector<2x32xf32>
    %175 = arith.cmpf ogt, %173, %174 : vector<2x32xf32>
    %176 = math.exp %173 : vector<2x32xf32>
    %cst_124 = arith.constant 1.000000e+00 : f32
    %177 = vector.broadcast %cst_124 : f32 to vector<2x32xf32>
    %178 = arith.subf %176, %177 : vector<2x32xf32>
    %179 = arith.select %175, %173, %178 : vector<2x32xi1>, vector<2x32xf32>
    %180 = arith.truncf %179 : vector<2x32xf32> to vector<2x32xbf16>
    %c5_125 = arith.constant 5 : index
    %c0_126 = arith.constant 0 : index
    %c0_127 = arith.constant 0 : index
    %181 = vector.load %arg4[%c5_125, %c0_126, %c0_127] : memref<8x32x32xbf16, #tpu.memory_space<vmem>>, vector<1x32x32xbf16>
    %182 = vector.shape_cast %181 : vector<1x32x32xbf16> to vector<32x32xbf16>
    %cst_128 = arith.constant dense<0.000000e+00> : vector<2x32xf32>
    %183 = tpu.matmul %180, %182, %cst_128 {dimension_numbers = #tpu.dot_dimension_numbers<[1], [0], [0], [1], [0, 0, 1, 1], [], []>} : vector<2x32xbf16>, vector<32x32xbf16>, vector<2x32xf32> -> vector<2x32xf32>
    %c5_129 = arith.constant 5 : index
    %c0_130 = arith.constant 0 : index
    %c0_131 = arith.constant 0 : index
    %184 = vector.load %arg5[%c5_129, %c0_130, %c0_131] : memref<8x1x32xf32, #tpu.memory_space<vmem>>, vector<1x1x32xf32>
    %185 = vector.shape_cast %184 : vector<1x1x32xf32> to vector<1x32xf32>
    %186 = vector.broadcast %185 : vector<1x32xf32> to vector<2x32xf32>
    %187 = arith.addf %183, %186 : vector<2x32xf32>
    %cst_132 = arith.constant 0.000000e+00 : f32
    %188 = vector.broadcast %cst_132 : f32 to vector<2x32xf32>
    %189 = arith.cmpf ogt, %187, %188 : vector<2x32xf32>
    %190 = math.exp %187 : vector<2x32xf32>
    %cst_133 = arith.constant 1.000000e+00 : f32
    %191 = vector.broadcast %cst_133 : f32 to vector<2x32xf32>
    %192 = arith.subf %190, %191 : vector<2x32xf32>
    %193 = arith.select %189, %187, %192 : vector<2x32xi1>, vector<2x32xf32>
    %194 = arith.truncf %193 : vector<2x32xf32> to vector<2x32xbf16>
    %c0_134 = arith.constant 0 : index
    %c5_135 = arith.constant 5 : index
    %c0_136 = arith.constant 0 : index
    %195 = vector.load %arg6[%c0_134, %c5_135, %c0_136] : memref<2x8x32xbf16, #tpu.memory_space<vmem>>, vector<2x1x32xbf16>
    %196 = vector.shape_cast %195 : vector<2x1x32xbf16> to vector<2x32xbf16>
    %197 = vector.shape_cast %194 : vector<2x32xbf16> to vector<2x1x32xbf16>
    tpu.vector_store %arg6[%c0_134, %c5_135, %c0_136], %197 {strides = array<i32>} : memref<2x8x32xbf16, #tpu.memory_space<vmem>>, vector<2x1x32xbf16>,
    %c6 = arith.constant 6 : index
    %c0_137 = arith.constant 0 : index
    %c0_138 = arith.constant 0 : index
    %198 = vector.load %arg1[%c6, %c0_137, %c0_138] : memref<8x2x128xbf16, #tpu.memory_space<vmem>>, vector<1x2x128xbf16>
    %199 = vector.shape_cast %198 : vector<1x2x128xbf16> to vector<2x128xbf16>
    %c6_139 = arith.constant 6 : index
    %c0_140 = arith.constant 0 : index
    %c0_141 = arith.constant 0 : index
    %200 = vector.load %arg2[%c6_139, %c0_140, %c0_141] : memref<8x128x32xbf16, #tpu.memory_space<vmem>>, vector<1x128x32xbf16>
    %201 = vector.shape_cast %200 : vector<1x128x32xbf16> to vector<128x32xbf16>
    %cst_142 = arith.constant dense<0.000000e+00> : vector<2x32xf32>
    %202 = tpu.matmul %199, %201, %cst_142 {dimension_numbers = #tpu.dot_dimension_numbers<[1], [0], [0], [1], [0, 0, 1, 1], [], []>} : vector<2x128xbf16>, vector<128x32xbf16>, vector<2x32xf32> -> vector<2x32xf32>
    %c6_143 = arith.constant 6 : index
    %c0_144 = arith.constant 0 : index
    %c0_145 = arith.constant 0 : index
    %203 = vector.load %arg3[%c6_143, %c0_144, %c0_145] : memref<8x1x32xf32, #tpu.memory_space<vmem>>, vector<1x1x32xf32>
    %204 = vector.shape_cast %203 : vector<1x1x32xf32> to vector<1x32xf32>
    %205 = vector.broadcast %204 : vector<1x32xf32> to vector<2x32xf32>
    %206 = arith.addf %202, %205 : vector<2x32xf32>
    %cst_146 = arith.constant 0.000000e+00 : f32
    %207 = vector.broadcast %cst_146 : f32 to vector<2x32xf32>
    %208 = arith.cmpf ogt, %206, %207 : vector<2x32xf32>
    %209 = math.exp %206 : vector<2x32xf32>
    %cst_147 = arith.constant 1.000000e+00 : f32
    %210 = vector.broadcast %cst_147 : f32 to vector<2x32xf32>
    %211 = arith.subf %209, %210 : vector<2x32xf32>
    %212 = arith.select %208, %206, %211 : vector<2x32xi1>, vector<2x32xf32>
    %213 = arith.truncf %212 : vector<2x32xf32> to vector<2x32xbf16>
    %c6_148 = arith.constant 6 : index
    %c0_149 = arith.constant 0 : index
    %c0_150 = arith.constant 0 : index
    %214 = vector.load %arg4[%c6_148, %c0_149, %c0_150] : memref<8x32x32xbf16, #tpu.memory_space<vmem>>, vector<1x32x32xbf16>
    %215 = vector.shape_cast %214 : vector<1x32x32xbf16> to vector<32x32xbf16>
    %cst_151 = arith.constant dense<0.000000e+00> : vector<2x32xf32>
    %216 = tpu.matmul %213, %215, %cst_151 {dimension_numbers = #tpu.dot_dimension_numbers<[1], [0], [0], [1], [0, 0, 1, 1], [], []>} : vector<2x32xbf16>, vector<32x32xbf16>, vector<2x32xf32> -> vector<2x32xf32>
    %c6_152 = arith.constant 6 : index
    %c0_153 = arith.constant 0 : index
    %c0_154 = arith.constant 0 : index
    %217 = vector.load %arg5[%c6_152, %c0_153, %c0_154] : memref<8x1x32xf32, #tpu.memory_space<vmem>>, vector<1x1x32xf32>
    %218 = vector.shape_cast %217 : vector<1x1x32xf32> to vector<1x32xf32>
    %219 = vector.broadcast %218 : vector<1x32xf32> to vector<2x32xf32>
    %220 = arith.addf %216, %219 : vector<2x32xf32>
    %cst_155 = arith.constant 0.000000e+00 : f32
    %221 = vector.broadcast %cst_155 : f32 to vector<2x32xf32>
    %222 = arith.cmpf ogt, %220, %221 : vector<2x32xf32>
    %223 = math.exp %220 : vector<2x32xf32>
    %cst_156 = arith.constant 1.000000e+00 : f32
    %224 = vector.broadcast %cst_156 : f32 to vector<2x32xf32>
    %225 = arith.subf %223, %224 : vector<2x32xf32>
    %226 = arith.select %222, %220, %225 : vector<2x32xi1>, vector<2x32xf32>
    %227 = arith.truncf %226 : vector<2x32xf32> to vector<2x32xbf16>
    %c0_157 = arith.constant 0 : index
    %c6_158 = arith.constant 6 : index
    %c0_159 = arith.constant 0 : index
    %228 = vector.load %arg6[%c0_157, %c6_158, %c0_159] : memref<2x8x32xbf16, #tpu.memory_space<vmem>>, vector<2x1x32xbf16>
    %229 = vector.shape_cast %228 : vector<2x1x32xbf16> to vector<2x32xbf16>
    %230 = vector.shape_cast %227 : vector<2x32xbf16> to vector<2x1x32xbf16>
    tpu.vector_store %arg6[%c0_157, %c6_158, %c0_159], %230 {strides = array<i32>} : memref<2x8x32xbf16, #tpu.memory_space<vmem>>, vector<2x1x32xbf16>,
    %c7 = arith.constant 7 : index
    %c0_160 = arith.constant 0 : index
    %c0_161 = arith.constant 0 : index
    %231 = vector.load %arg1[%c7, %c0_160, %c0_161] : memref<8x2x128xbf16, #tpu.memory_space<vmem>>, vector<1x2x128xbf16>
    %232 = vector.shape_cast %231 : vector<1x2x128xbf16> to vector<2x128xbf16>
    %c7_162 = arith.constant 7 : index
    %c0_163 = arith.constant 0 : index
    %c0_164 = arith.constant 0 : index
    %233 = vector.load %arg2[%c7_162, %c0_163, %c0_164] : memref<8x128x32xbf16, #tpu.memory_space<vmem>>, vector<1x128x32xbf16>
    %234 = vector.shape_cast %233 : vector<1x128x32xbf16> to vector<128x32xbf16>
    %cst_165 = arith.constant dense<0.000000e+00> : vector<2x32xf32>
    %235 = tpu.matmul %232, %234, %cst_165 {dimension_numbers = #tpu.dot_dimension_numbers<[1], [0], [0], [1], [0, 0, 1, 1], [], []>} : vector<2x128xbf16>, vector<128x32xbf16>, vector<2x32xf32> -> vector<2x32xf32>
    %c7_166 = arith.constant 7 : index
    %c0_167 = arith.constant 0 : index
    %c0_168 = arith.constant 0 : index
    %236 = vector.load %arg3[%c7_166, %c0_167, %c0_168] : memref<8x1x32xf32, #tpu.memory_space<vmem>>, vector<1x1x32xf32>
    %237 = vector.shape_cast %236 : vector<1x1x32xf32> to vector<1x32xf32>
    %238 = vector.broadcast %237 : vector<1x32xf32> to vector<2x32xf32>
    %239 = arith.addf %235, %238 : vector<2x32xf32>
    %cst_169 = arith.constant 0.000000e+00 : f32
    %240 = vector.broadcast %cst_169 : f32 to vector<2x32xf32>
    %241 = arith.cmpf ogt, %239, %240 : vector<2x32xf32>
    %242 = math.exp %239 : vector<2x32xf32>
    %cst_170 = arith.constant 1.000000e+00 : f32
    %243 = vector.broadcast %cst_170 : f32 to vector<2x32xf32>
    %244 = arith.subf %242, %243 : vector<2x32xf32>
    %245 = arith.select %241, %239, %244 : vector<2x32xi1>, vector<2x32xf32>
    %246 = arith.truncf %245 : vector<2x32xf32> to vector<2x32xbf16>
    %c7_171 = arith.constant 7 : index
    %c0_172 = arith.constant 0 : index
    %c0_173 = arith.constant 0 : index
    %247 = vector.load %arg4[%c7_171, %c0_172, %c0_173] : memref<8x32x32xbf16, #tpu.memory_space<vmem>>, vector<1x32x32xbf16>
    %248 = vector.shape_cast %247 : vector<1x32x32xbf16> to vector<32x32xbf16>
    %cst_174 = arith.constant dense<0.000000e+00> : vector<2x32xf32>
    %249 = tpu.matmul %246, %248, %cst_174 {dimension_numbers = #tpu.dot_dimension_numbers<[1], [0], [0], [1], [0, 0, 1, 1], [], []>} : vector<2x32xbf16>, vector<32x32xbf16>, vector<2x32xf32> -> vector<2x32xf32>
    %c7_175 = arith.constant 7 : index
    %c0_176 = arith.constant 0 : index
    %c0_177 = arith.constant 0 : index
    %250 = vector.load %arg5[%c7_175, %c0_176, %c0_177] : memref<8x1x32xf32, #tpu.memory_space<vmem>>, vector<1x1x32xf32>
    %251 = vector.shape_cast %250 : vector<1x1x32xf32> to vector<1x32xf32>
    %252 = vector.broadcast %251 : vector<1x32xf32> to vector<2x32xf32>
    %253 = arith.addf %249, %252 : vector<2x32xf32>
    %cst_178 = arith.constant 0.000000e+00 : f32
    %254 = vector.broadcast %cst_178 : f32 to vector<2x32xf32>
    %255 = arith.cmpf ogt, %253, %254 : vector<2x32xf32>
    %256 = math.exp %253 : vector<2x32xf32>
    %cst_179 = arith.constant 1.000000e+00 : f32
    %257 = vector.broadcast %cst_179 : f32 to vector<2x32xf32>
    %258 = arith.subf %256, %257 : vector<2x32xf32>
    %259 = arith.select %255, %253, %258 : vector<2x32xi1>, vector<2x32xf32>
    %260 = arith.truncf %259 : vector<2x32xf32> to vector<2x32xbf16>
    %c0_180 = arith.constant 0 : index
    %c7_181 = arith.constant 7 : index
    %c0_182 = arith.constant 0 : index
    %261 = vector.load %arg6[%c0_180, %c7_181, %c0_182] : memref<2x8x32xbf16, #tpu.memory_space<vmem>>, vector<2x1x32xbf16>
    %262 = vector.shape_cast %261 : vector<2x1x32xbf16> to vector<2x32xbf16>
    %263 = vector.shape_cast %260 : vector<2x32xbf16> to vector<2x1x32xbf16>
    tpu.vector_store %arg6[%c0_180, %c7_181, %c0_182], %263 {strides = array<i32>} : memref<2x8x32xbf16, #tpu.memory_space<vmem>>, vector<2x1x32xbf16>,
    return
  }
  func.func @transform_0(%arg0: i32) -> (i32, i32, i32) {
    %c0_i32 = arith.constant 0 : i32
    %c0_i32_0 = arith.constant 0 : i32
    %c0_i32_1 = arith.constant 0 : i32
    return %arg0, %c0_i32, %c0_i32_0 : i32, i32, i32
  }
  func.func @transform_1(%arg0: i32) -> (i32, i32, i32) {
    %c0_i32 = arith.constant 0 : i32
    %c0_i32_0 = arith.constant 0 : i32
    %c0_i32_1 = arith.constant 0 : i32
    return %arg0, %c0_i32, %c0_i32_0 : i32, i32, i32
  }
  func.func @transform_2(%arg0: i32) -> (i32, i32, i32) {
    %c0_i32 = arith.constant 0 : i32
    %c0_i32_0 = arith.constant 0 : i32
    %c0_i32_1 = arith.constant 0 : i32
    return %arg0, %c0_i32, %c0_i32_0 : i32, i32, i32
  }
  func.func @transform_3(%arg0: i32) -> (i32, i32, i32) {
    %c0_i32 = arith.constant 0 : i32
    %c0_i32_0 = arith.constant 0 : i32
    %c0_i32_1 = arith.constant 0 : i32
    return %arg0, %c0_i32, %c0_i32_0 : i32, i32, i32
  }
  func.func @transform_4(%arg0: i32) -> (i32, i32, i32) {
    %c0_i32 = arith.constant 0 : i32
    %c0_i32_0 = arith.constant 0 : i32
    %c0_i32_1 = arith.constant 0 : i32
    return %arg0, %c0_i32, %c0_i32_0 : i32, i32, i32
  }
  func.func @transform_5(%arg0: i32) -> (i32, i32, i32) {
    %c0_i32 = arith.constant 0 : i32
    %c0_i32_0 = arith.constant 0 : i32
    %c0_i32_1 = arith.constant 0 : i32
    return %c0_i32, %arg0, %c0_i32_0 : i32, i32, i32
  }
}

</mosaic_0001>

<bundles_post_ra>
// kernel: tpu_custom_call.1
= control target key start
LH: loop header
LB: loop body
LE: loop exit
PB: predicated region body
PF: predicated region fallthrough
CT: control target
= control target key end

     0   :  { %v2694_v1 = vmov 0.0   ;;  %vm2695_vm0 = vmmov 0   ;;  %s3219_s0 = inlined_call_operand.vmem [shape: bf16[8,2,128], index: 0, kind: input, shape index: {}]   ;;  %s3220_s1 = inlined_call_operand.vmem [shape: bf16[8,128,32], index: 1, kind: input, shape index: {}]   ;;  %s3221_s2 = inlined_call_operand.vmem [shape: f32[8,1,32], index: 2, kind: input, shape index: {}]   ;;  %s3222_s3 = inlined_call_operand.vmem [shape: bf16[8,32,32], index: 3, kind: input, shape index: {}]   ;;  %s3223_s4 = inlined_call_operand.vmem [shape: f32[8,1,32], index: 4, kind: input, shape index: {}]   ;;  %s3224_s5 = inlined_call_operand.hbm [shape: bf16[2,8,32], index: 5, kind: output, shape index: {}]  }
   0x1   :  { %v2558_v0 = vld [vmem:[%s3220_s1] sm:$0xff]   ;;  %2327 = vmatprep.subr.bf16.mxu0 %v2694_v1  ;;  %2347 = vmatprep.subr.bf16.mxu1 %v2694_v1  ;;  %v2559_v2 = vld [vmem:[%s3220_s1 + $0x8] sm:$0xff]   ;;  %v2560_v3 = vld [vmem:[%s3220_s1 + $0x10] sm:$0xff]  }
   0x2   :  { %2328 = vmatpush3.bf16.msra.mxu0 %v2558_v0  ;;  %2343 = vmatprep.mubr.msk.bf16.mxu0 %vm2695_vm0, %v2694_v1  ;;  %v2561_v4 = vld [vmem:[%s3220_s1 + $0x18] sm:$0xff]   ;;  %v2562_v5 = vld [vmem:[%s3220_s1 + $0x20] sm:$0xff]   ;;  %v2563_v6 = vld [vmem:[%s3220_s1 + $0x28] sm:$0xff]  }
   0x3   :  { %2329 = vmatprep.subr.bf16.mxu0 %v2694_v1  ;;  %2351 = vmatprep.mubr.msk.bf16.mxu1 %vm2695_vm0, %v2694_v1  ;;  %v2564_v7 = vld [vmem:[%s3220_s1 + $0x30] sm:$0xff]   ;;  %v2565_v8 = vld [vmem:[%s3220_s1 + $0x38] sm:$0xff]   ;;  %v22_v9 = vld [vmem:[%s3219_s0] sm:$0x1] }
   0x6   :  { %2330 = vmatpush3.bf16.msra.mxu0 %v2559_v2 }
   0x7   :  { %2331 = vmatprep.subr.bf16.mxu0 %v2694_v1 }
   0xa   :  { %2332 = vmatpush3.bf16.msra.mxu0 %v2560_v3 }
   0xb   :  { %2333 = vmatprep.subr.bf16.mxu0 %v2694_v1 }
   0xe   :  { %2334 = vmatpush3.bf16.msra.mxu0 %v2561_v4 }
   0xf   :  { %2335 = vmatprep.subr.bf16.mxu0 %v2694_v1 }
  0x12   :  { %2336 = vmatpush3.bf16.msra.mxu0 %v2562_v5 }
  0x13   :  { %2337 = vmatprep.subr.bf16.mxu0 %v2694_v1 }
  0x16   :  { %2338 = vmatpush3.bf16.msra.mxu0 %v2563_v6 }
  0x17   :  { %2339 = vmatprep.subr.bf16.mxu0 %v2694_v1 }
  0x1a   :  { %2340 = vmatpush3.bf16.msra.mxu0 %v2564_v7 }
  0x1b   :  { %2341 = vmatprep.subr.bf16.mxu0 %v2694_v1 }
  0x1e   :  { %2342 = vmatpush3.bf16.msra.mxu0 %v2565_v8 }
  0x1f   :  { %2375 = vmatprep.subr.bf16.mxu0 %v2694_v1 }
  0x21   :  { %2344 = vmatmul.mubr.bf16.vlgmr.msra.gmra.mrb[0].mxu0 %v22_v9 }
  0x22   :  { %2379 = vmatprep.mubr.msk.bf16.mxu0 %vm2695_vm0, %v2694_v1 }
  0x23   :  { %10 = vsyncpa [#allocation3], 0  ;;  %v2566_v10 = vld [vmem:[%s3222_s3] sm:$0xff]   ;;  %v2567_v11 = vld [vmem:[%s3222_s3 + $0x8] sm:$0xff]   ;;  %vm163_vm2 = vcmask 261120   ;;  %v217_v43 = vlaneseq  ;;  %v2697_v47 = vmov 286326784  }
  0x24   :  { %2348 = vmatpush3.bf16.msra.mxu1 %v2566_v10  ;;  %v1942_v12 = vld [vmem:[%s3221_s2] ss:$0 sm:$0xff]  ;;  %v2569_v24 = vld [vmem:[%s3220_s1 + $0x48] sm:$0xff]   ;;  %v2570_v25 = vld [vmem:[%s3220_s1 + $0x50] sm:$0xff]   ;;  %v2696_v41 = vmov 1966171168   ;;  %v233_v48 = vunpack.c.l.s4 %v2697_v47 }
  0x25   :  { %2349 = vmatprep.subr.bf16.mxu1 %v2694_v1  ;;  %v2568_v22 = vld [vmem:[%s3220_s1 + $0x40] sm:$0xff]   ;;  %v2571_v26 = vld [vmem:[%s3220_s1 + $0x58] sm:$0xff]   ;;  %v2573_v28 = vld [vmem:[%s3220_s1 + $0x68] sm:$0xff]   ;;  %v215_v42 = vunpack.c.l.s4 %v2696_v41  ;;  %v218_v45 = vshrl.u32 %v217_v43, 7  ;;  %vm248_vm4 = vcmask 253952   ;;  %vm725_vm13 = vcmask 254977  }
  0x26   :  { %v2572_v27 = vld [vmem:[%s3220_s1 + $0x60] sm:$0xff]   ;;  %v2574_v29 = vld [vmem:[%s3220_s1 + $0x70] sm:$0xff]   ;;  %v2575_v30 = vld [vmem:[%s3220_s1 + $0x78] sm:$0xff]   ;;  %v234_v53 = vunpack.c.0.s8 %v233_v48  ;;  %vm249_vm5 = vsmask.f32 256 }
  0x27   :  { %v1958_v31 = vld [vmem:[%s3219_s0 + $0x1] sm:$0x1]  ;;  %v2576_v32 = vld [vmem:[%s3222_s3 + $0x10] sm:$0xff]   ;;  %v2577_v33 = vld [vmem:[%s3222_s3 + $0x18] sm:$0xff]   ;;  %v216_v44 = vunpack.c.0.s8 %v215_v42  ;;  %vm487_vm9 = vsmask.f32 7938 }
  0x28   :  { %2350 = vmatpush3.bf16.msra.mxu1 %v2567_v11  ;;  %2376 = vmatpush3.bf16.msra.mxu0 %v2576_v32  ;;  %v1952_v34 = vld [vmem:[%s3223_s4] ss:$0 sm:$0xff]  ;;  %v2840_v56 = vsub.s32 %v234_v53, %v218_v45  ;;  %vm250_vm6 = vmand %vm248_vm4, %vm249_vm5  ;;  %v254_v62 = vld [vmem:[#allocation2 + $0x4] sm:$0x1]  ;;  %vm726_vm14 = vsmask.f32 1280 }
  0x29   :  { %2355 = vmatprep.subr.bf16.mxu1 %v2694_v1  ;;  %2377 = vmatprep.subr.bf16.mxu0 %v2694_v1  ;;  %v2836_v50 = vsub.s32 %v216_v44, %v218_v45  ;;  %v251_v59 = vld [vmem:[#allocation2] sm:$0x1]  ;;  %v1976_v2 = vld [vmem:[%s3221_s2 + $0x1] ss:$0 sm:$0xff]  ;;  %vm488_vm10 = vmand %vm248_vm4, %vm487_vm9  ;;  %vm964_vm4 = vsmask.f32 7942 }
  0x2a   :  { %vm727_vm15 = vmand %vm725_vm13, %vm726_vm14  ;;  %vm1203_vm9 = vsmask.f32 2304 }
  0x2b   :  { %vm965_vm5 = vmand %vm725_vm13, %vm964_vm4  ;;  %vm1441_vm13 = vsmask.f32 7946 }
  0x2c   :  { %2378 = vmatpush3.bf16.msra.mxu0 %v2577_v33 }
  0x2d   :  { %2383 = vmatprep.subr.bf16.mxu0 %v2694_v1 }
  0xf4   :  { %v128_v13 = vpop.f32.mrb[0].mxu0 }
  0xf5   :  { %v129_v14 = vadd.f32 %v1942_v12, %v128_v13  ;;  %v2345_v15 = vpop.f32.mrb[1].mxu0  ;;  %v2578_v13 = vld [vmem:[%s3220_s1 + $0x80] sm:$0xff]  }
  0xf6   :  { %v131_v16 = vpop.f32.mrb[2].mxu0  ;;  %v2579_v15 = vld [vmem:[%s3220_s1 + $0x88] sm:$0xff]  }
  0xf7   :  { %v135_v17 = vmul.f32 1.442695, %v129_v14  ;;  %v2346_v18 = vpop.f32.mrb[3].mxu0  ;;  %vm134_vm1 = vcmp.gt.f32.partialorder %v129_v14, 0.0  ;;  %v2580_v16 = vld [vmem:[%s3220_s1 + $0x90] sm:$0xff]  }
  0xf8   :  { %v2582_v18 = vld [vmem:[%s3220_s1 + $0xa0] sm:$0xff]  }
  0xf9   :  { %2638 = vpow2.f32 %v135_v17  ;;  %v2581_v17 = vld [vmem:[%s3220_s1 + $0x98] sm:$0xff]  }
 0x103   :  { %v2639_v19 = vpop.eup %2638 }
 0x104   :  { %v1951_v20 = vadd.f32 -1.0, %v2639_v19  ;;  %v2583_v19 = vld [vmem:[%s3220_s1 + $0xa8] sm:$0xff]  }
 0x106   :  { %v138_v21 = vsel %vm134_vm1, %v129_v14, %v1951_v20  ;;  %v2584_v20 = vld [vmem:[%s3220_s1 + $0xb0] sm:$0xff]  }
 0x107   :  { %v139_v23 = vpack.c.bf16 %v138_v21, %v138_v21  ;;  %v2585_v21 = vld [vmem:[%s3220_s1 + $0xb8] sm:$0xff]  }
 0x109   :  { %2352 = vmatmul.mubr.msk.bf16.vlgmr.msra.gmra.mrb[0].mxu1 %vm163_vm2, %v139_v23  ;;  %v2586_v23 = vld [vmem:[%s3222_s3 + $0x20] sm:$0xff]  }
 0x10a   :  { %2356 = vmatpush3.bf16.msra.mxu1 %v2568_v22  ;;  %2371 = vmatprep.mubr.msk.bf16.mxu1 %vm2695_vm0, %v2694_v1  ;;  %v1997_v22 = vld [vmem:[%s3219_s0 + $0x2] sm:$0x1] }
 0x10b   :  { %2357 = vmatprep.subr.bf16.mxu1 %v2694_v1 }
 0x10e   :  { %2358 = vmatpush3.bf16.msra.mxu1 %v2569_v24  ;;  %v2587_v24 = vld [vmem:[%s3222_s3 + $0x28] sm:$0xff]  }
 0x10f   :  { %2359 = vmatprep.subr.bf16.mxu1 %v2694_v1 }
 0x112   :  { %2360 = vmatpush3.bf16.msra.mxu1 %v2570_v25  ;;  %v1991_v25 = vld [vmem:[%s3223_s4 + $0x1] ss:$0 sm:$0xff] }
 0x113   :  { %2361 = vmatprep.subr.bf16.mxu1 %v2694_v1 }
 0x116   :  { %2362 = vmatpush3.bf16.msra.mxu1 %v2571_v26 }
 0x117   :  { %2363 = vmatprep.subr.bf16.mxu1 %v2694_v1 }
 0x11a   :  { %2364 = vmatpush3.bf16.msra.mxu1 %v2572_v27 }
 0x11b   :  { %2365 = vmatprep.subr.bf16.mxu1 %v2694_v1 }
 0x11e   :  { %2366 = vmatpush3.bf16.msra.mxu1 %v2573_v28 }
 0x11f   :  { %2367 = vmatprep.subr.bf16.mxu1 %v2694_v1 }
 0x122   :  { %2368 = vmatpush3.bf16.msra.mxu1 %v2574_v29 }
 0x123   :  { %2369 = vmatprep.subr.bf16.mxu1 %v2694_v1 }
 0x126   :  { %2370 = vmatpush3.bf16.msra.mxu1 %v2575_v30 }
 0x127   :  { %2403 = vmatprep.subr.bf16.mxu1 %v2694_v1 }
 0x129   :  { %2372 = vmatmul.mubr.bf16.vlgmr.msra.gmra.mrb[4].mxu1 %v1958_v31 }
 0x12a   :  { %2407 = vmatprep.mubr.msk.bf16.mxu1 %vm2695_vm0, %v2694_v1  ;;  %2404 = vmatpush3.bf16.msra.mxu1 %v2586_v23  ;;  %v728_v23 = vld [vmem:[#allocation2] sm:$0x2] }
 0x12b   :  { %2405 = vmatprep.subr.bf16.mxu1 %v2694_v1 }
 0x12e   :  { %2406 = vmatpush3.bf16.msra.mxu1 %v2587_v24 }
 0x12f   :  { %2411 = vmatprep.subr.bf16.mxu1 %v2694_v1 }
 0x1dc   :  { %v201_v35 = vpop.f32.mrb[0].mxu1 }
 0x1dd   :  { %v202_v36 = vadd.f32 %v1952_v34, %v201_v35  ;;  %v2353_v37 = vpop.f32.mrb[1].mxu1 }
 0x1de   :  { %v204_v38 = vpop.f32.mrb[2].mxu1 }
 0x1df   :  { %v208_v39 = vmul.f32 1.442695, %v202_v36  ;;  %v2354_v40 = vpop.f32.mrb[3].mxu1  ;;  %vm207_vm3 = vcmp.gt.f32.partialorder %v202_v36, 0.0 }
 0x1e1   :  { %2640 = vpow2.f32 %v208_v39 }
 0x1eb   :  { %v2641_v46 = vpop.eup %2640 }
 0x1ec   :  { %v1956_v49 = vadd.f32 -1.0, %v2641_v46  ;;  %v2015_v46 = vld [vmem:[%s3221_s2 + $0x2] ss:$0 sm:$0xff] }
 0x1ee   :  { %v211_v51 = vsel %vm207_vm3, %v202_v36, %v1956_v49 }
 0x1ef   :  { %v212_v52 = vpack.c.bf16 %v211_v51, %v211_v51 }
 0x1f1   :  { %v220_v54 = vrot.slane %v212_v52, %v2836_v50 }
 0x1f3   :  { %v227_v55 = vrot.slane %v220_v54, %v2836_v50 }
 0x1f5   :  { %v229_v57 = vunpack.i.h.s16 %v227_v55  ;;  %v1957_v58 = vpack.i.b16 %v227_v55, %v227_v55 }
 0x1f7   :  { %v231_v60 = vpack.i.b16 %v229_v57, %v229_v57  ;;  %v238_v61 = vrot.slane %v1957_v58, %v2840_v56 }
 0x1f9   :  { %v245_v63 = vrot.slane %v231_v60, %v2840_v56  ;;  %v252_v0 = vsel %vm250_vm6, %v238_v61, %v251_v59  ;;  %v2588_v59 = vld [vmem:[%s3220_s1 + $0xc0] sm:$0xff]   ;;  %v2589_v61 = vld [vmem:[%s3220_s1 + $0xc8] sm:$0xff]  }
 0x1fa   :  { %253 = vst [vmem:[#allocation2] sm:$0x1] %v252_v0  ;;  %v2592_v0 = vld [vmem:[%s3220_s1 + $0xe0] sm:$0xff]  }
 0x1fb   :  { %v255_v3 = vsel %vm250_vm6, %v245_v63, %v254_v62  ;;  %v2590_v62 = vld [vmem:[%s3220_s1 + $0xd0] sm:$0xff]   ;;  %v2591_v63 = vld [vmem:[%s3220_s1 + $0xd8] sm:$0xff]  }
 0x1fc   :  { %256 = vst [vmem:[#allocation2 + $0x4] sm:$0x1] %v255_v3  ;;  %v366_v4 = vpop.f32.mrb[4].mxu1  ;;  %v2594_v3 = vld [vmem:[%s3220_s1 + $0xf0] sm:$0xff]  }
 0x1fd   :  { %v367_v5 = vadd.f32 %v1976_v2, %v366_v4  ;;  %v2373_v6 = vpop.f32.mrb[5].mxu1  ;;  %v2593_v2 = vld [vmem:[%s3220_s1 + $0xe8] sm:$0xff]   ;;  %v2595_v4 = vld [vmem:[%s3220_s1 + $0xf8] sm:$0xff]  }
 0x1fe   :  { %v369_v7 = vpop.f32.mrb[6].mxu1  ;;  %v2596_v6 = vld [vmem:[%s3222_s3 + $0x30] sm:$0xff]  }
 0x1ff   :  { %v373_v8 = vmul.f32 1.442695, %v367_v5  ;;  %v2374_v9 = vpop.f32.mrb[7].mxu1  ;;  %vm372_vm7 = vcmp.gt.f32.partialorder %v367_v5, 0.0  ;;  %v2597_v7 = vld [vmem:[%s3222_s3 + $0x38] sm:$0xff]  }
 0x201   :  { %2642 = vpow2.f32 %v373_v8  ;;  %v489_v42 = vld [vmem:[#allocation2] sm:$0x1]  ;;  %v2030_v8 = vld [vmem:[%s3223_s4 + $0x2] ss:$0 sm:$0xff] }
 0x203   :  { %v492_v45 = vld [vmem:[#allocation2 + $0x4] sm:$0x1] }
 0x20b   :  { %v2643_v10 = vpop.eup %2642 }
 0x20c   :  { %v1985_v11 = vadd.f32 -1.0, %v2643_v10 }
 0x20e   :  { %v376_v12 = vsel %vm372_vm7, %v367_v5, %v1985_v11  ;;  %v2036_v5 = vld [vmem:[%s3219_s0 + $0x3] sm:$0x1] }
 0x20f   :  { %v377_v14 = vpack.c.bf16 %v376_v12, %v376_v12 }
 0x211   :  { %2380 = vmatmul.mubr.msk.bf16.vlgmr.msra.gmra.mrb[4].mxu0 %vm163_vm2, %v377_v14 }
 0x212   :  { %2384 = vmatpush3.bf16.msra.mxu0 %v2578_v13  ;;  %2399 = vmatprep.mubr.msk.bf16.mxu0 %vm2695_vm0, %v2694_v1 }
 0x213   :  { %2385 = vmatprep.subr.bf16.mxu0 %v2694_v1 }
 0x216   :  { %2386 = vmatpush3.bf16.msra.mxu0 %v2579_v15 }
 0x217   :  { %2387 = vmatprep.subr.bf16.mxu0 %v2694_v1 }
 0x21a   :  { %2388 = vmatpush3.bf16.msra.mxu0 %v2580_v16 }
 0x21b   :  { %2389 = vmatprep.subr.bf16.mxu0 %v2694_v1 }
 0x21e   :  { %2390 = vmatpush3.bf16.msra.mxu0 %v2581_v17 }
 0x21f   :  { %2391 = vmatprep.subr.bf16.mxu0 %v2694_v1 }
 0x222   :  { %2392 = vmatpush3.bf16.msra.mxu0 %v2582_v18 }
 0x223   :  { %2393 = vmatprep.subr.bf16.mxu0 %v2694_v1 }
 0x226   :  { %2394 = vmatpush3.bf16.msra.mxu0 %v2583_v19 }
 0x227   :  { %2395 = vmatprep.subr.bf16.mxu0 %v2694_v1 }
 0x22a   :  { %2396 = vmatpush3.bf16.msra.mxu0 %v2584_v20 }
 0x22b   :  { %2397 = vmatprep.subr.bf16.mxu0 %v2694_v1 }
 0x22e   :  { %2398 = vmatpush3.bf16.msra.mxu0 %v2585_v21 }
 0x22f   :  { %2431 = vmatprep.subr.bf16.mxu0 %v2694_v1 }
 0x231   :  { %2400 = vmatmul.mubr.bf16.vlgmr.msra.gmra.mrb[8].mxu0 %v1997_v22 }
 0x232   :  { %2435 = vmatprep.mubr.msk.bf16.mxu0 %vm2695_vm0, %v2694_v1  ;;  %2432 = vmatpush3.bf16.msra.mxu0 %v2596_v6 }
 0x233   :  { %2433 = vmatprep.subr.bf16.mxu0 %v2694_v1 }
 0x236   :  { %2434 = vmatpush3.bf16.msra.mxu0 %v2597_v7 }
 0x237   :  { %2439 = vmatprep.subr.bf16.mxu0 %v2694_v1 }
 0x2e4   :  { %v440_v26 = vpop.f32.mrb[4].mxu0 }
 0x2e5   :  { %v441_v27 = vadd.f32 %v1991_v25, %v440_v26  ;;  %v2381_v28 = vpop.f32.mrb[5].mxu0  ;;  %v731_v26 = vld [vmem:[#allocation2 + $0x4] sm:$0x2] }
 0x2e6   :  { %v443_v29 = vpop.f32.mrb[6].mxu0 }
 0x2e7   :  { %v447_v30 = vmul.f32 1.442695, %v441_v27  ;;  %v2382_v31 = vpop.f32.mrb[7].mxu0  ;;  %vm446_vm8 = vcmp.gt.f32.partialorder %v441_v27, 0.0  ;;  %v2054_v29 = vld [vmem:[%s3221_s2 + $0x3] ss:$0 sm:$0xff] }
 0x2e9   :  { %2644 = vpow2.f32 %v447_v30 }
 0x2f3   :  { %v2645_v32 = vpop.eup %2644 }
 0x2f4   :  { %v1995_v33 = vadd.f32 -1.0, %v2645_v32 }
 0x2f6   :  { %v450_v34 = vsel %vm446_vm8, %v441_v27, %v1995_v33  ;;  %vm1202_vm8 = vcmask 256002  }
 0x2f7   :  { %v451_v35 = vpack.c.bf16 %v450_v34, %v450_v34  ;;  %vm1442_vm14 = vmand %vm1202_vm8, %vm1441_vm13 }
 0x2f9   :  { %v459_v36 = vrot.slane %v451_v35, %v2836_v50 }
 0x2fb   :  { %v466_v37 = vrot.slane %v459_v36, %v2836_v50 }
 0x2fd   :  { %v468_v38 = vunpack.i.h.s16 %v466_v37  ;;  %v1996_v39 = vpack.i.b16 %v466_v37, %v466_v37 }
 0x2ff   :  { %v470_v40 = vpack.i.b16 %v468_v38, %v468_v38  ;;  %v477_v41 = vrot.slane %v1996_v39, %v2840_v56 }
 0x301   :  { %v484_v43 = vrot.slane %v470_v40, %v2840_v56  ;;  %v490_v44 = vsel %vm488_vm10, %v477_v41, %v489_v42  ;;  %v2598_v40 = vld [vmem:[%s3220_s1 + $0x100] sm:$0xff]   ;;  %v2599_v42 = vld [vmem:[%s3220_s1 + $0x108] sm:$0xff]  }
 0x302   :  { %491 = vst [vmem:[#allocation2] sm:$0x1] %v490_v44  ;;  %v2601_v44 = vld [vmem:[%s3220_s1 + $0x118] sm:$0xff]  }
 0x303   :  { %v493_v47 = vsel %vm488_vm10, %v484_v43, %v492_v45  ;;  %v2600_v43 = vld [vmem:[%s3220_s1 + $0x110] sm:$0xff]   ;;  %v2602_v45 = vld [vmem:[%s3220_s1 + $0x120] sm:$0xff]   ;;  %vm1204_vm10 = vmand %vm1202_vm8, %vm1203_vm9 }
 0x304   :  { %494 = vst [vmem:[#allocation2 + $0x4] sm:$0x1] %v493_v47  ;;  %v604_v48 = vpop.f32.mrb[8].mxu0  ;;  %v2604_v47 = vld [vmem:[%s3220_s1 + $0x130] sm:$0xff]  }
 0x305   :  { %v605_v49 = vadd.f32 %v2015_v46, %v604_v48  ;;  %v2401_v51 = vpop.f32.mrb[9].mxu0  ;;  %v2603_v46 = vld [vmem:[%s3220_s1 + $0x128] sm:$0xff]   ;;  %v2605_v48 = vld [vmem:[%s3220_s1 + $0x138] sm:$0xff]  }
 0x306   :  { %v607_v52 = vpop.f32.mrb[10].mxu0  ;;  %v2606_v51 = vld [vmem:[%s3222_s3 + $0x40] sm:$0xff]  }
 0x307   :  { %v611_v53 = vmul.f32 1.442695, %v605_v49  ;;  %v2402_v54 = vpop.f32.mrb[11].mxu0  ;;  %vm610_vm11 = vcmp.gt.f32.partialorder %v605_v49, 0.0  ;;  %v2607_v52 = vld [vmem:[%s3222_s3 + $0x48] sm:$0xff]  }
 0x309   :  { %2646 = vpow2.f32 %v611_v53  ;;  %v2069_v53 = vld [vmem:[%s3223_s4 + $0x3] ss:$0 sm:$0xff] }
 0x313   :  { %v2647_v55 = vpop.eup %2646 }
 0x314   :  { %v2024_v57 = vadd.f32 -1.0, %v2647_v55 }
 0x316   :  { %v614_v58 = vsel %vm610_vm11, %v605_v49, %v2024_v57  ;;  %v2075_v49 = vld [vmem:[%s3219_s0 + $0x4] sm:$0x1] }
 0x317   :  { %v615_v60 = vpack.c.bf16 %v614_v58, %v614_v58 }
 0x319   :  { %2408 = vmatmul.mubr.msk.bf16.vlgmr.msra.gmra.mrb[8].mxu1 %vm163_vm2, %v615_v60 }
 0x31a   :  { %2412 = vmatpush3.bf16.msra.mxu1 %v2588_v59  ;;  %2427 = vmatprep.mubr.msk.bf16.mxu1 %vm2695_vm0, %v2694_v1 }
 0x31b   :  { %2413 = vmatprep.subr.bf16.mxu1 %v2694_v1 }
 0x31e   :  { %2414 = vmatpush3.bf16.msra.mxu1 %v2589_v61 }
 0x31f   :  { %2415 = vmatprep.subr.bf16.mxu1 %v2694_v1 }
 0x322   :  { %2416 = vmatpush3.bf16.msra.mxu1 %v2590_v62 }
 0x323   :  { %2417 = vmatprep.subr.bf16.mxu1 %v2694_v1 }
 0x326   :  { %2418 = vmatpush3.bf16.msra.mxu1 %v2591_v63 }
 0x327   :  { %2419 = vmatprep.subr.bf16.mxu1 %v2694_v1 }
 0x32a   :  { %2420 = vmatpush3.bf16.msra.mxu1 %v2592_v0 }
 0x32b   :  { %2421 = vmatprep.subr.bf16.mxu1 %v2694_v1 }
 0x32e   :  { %2422 = vmatpush3.bf16.msra.mxu1 %v2593_v2 }
 0x32f   :  { %2423 = vmatprep.subr.bf16.mxu1 %v2694_v1 }
 0x332   :  { %2424 = vmatpush3.bf16.msra.mxu1 %v2594_v3 }
 0x333   :  { %2425 = vmatprep.subr.bf16.mxu1 %v2694_v1 }
 0x336   :  { %2426 = vmatpush3.bf16.msra.mxu1 %v2595_v4 }
 0x337   :  { %2459 = vmatprep.subr.bf16.mxu1 %v2694_v1 }
 0x339   :  { %2428 = vmatmul.mubr.bf16.vlgmr.msra.gmra.mrb[12].mxu1 %v2036_v5 }
 0x33a   :  { %2463 = vmatprep.mubr.msk.bf16.mxu1 %vm2695_vm0, %v2694_v1  ;;  %2460 = vmatpush3.bf16.msra.mxu1 %v2606_v51  ;;  %v1205_v51 = vld [vmem:[#allocation2] sm:$0x4] }
 0x33b   :  { %2461 = vmatprep.subr.bf16.mxu1 %v2694_v1 }
 0x33e   :  { %2462 = vmatpush3.bf16.msra.mxu1 %v2607_v52 }
 0x33f   :  { %2467 = vmatprep.subr.bf16.mxu1 %v2694_v1 }
 0x3ec   :  { %v678_v9 = vpop.f32.mrb[8].mxu1 }
 0x3ed   :  { %v679_v10 = vadd.f32 %v2030_v8, %v678_v9  ;;  %v2409_v11 = vpop.f32.mrb[9].mxu1 }
 0x3ee   :  { %v681_v12 = vpop.f32.mrb[10].mxu1 }
 0x3ef   :  { %v685_v13 = vmul.f32 1.442695, %v679_v10  ;;  %v2410_v14 = vpop.f32.mrb[11].mxu1  ;;  %vm684_vm12 = vcmp.gt.f32.partialorder %v679_v10, 0.0  ;;  %v2093_v12 = vld [vmem:[%s3221_s2 + $0x4] ss:$0 sm:$0xff] }
 0x3f1   :  { %2648 = vpow2.f32 %v685_v13 }
 0x3fb   :  { %v2649_v15 = vpop.eup %2648 }
 0x3fc   :  { %v2034_v16 = vadd.f32 -1.0, %v2649_v15 }
 0x3fe   :  { %v688_v17 = vsel %vm684_vm12, %v679_v10, %v2034_v16 }
 0x3ff   :  { %v689_v18 = vpack.c.bf16 %v688_v17, %v688_v17 }
 0x401   :  { %v697_v19 = vrot.slane %v689_v18, %v2836_v50 }
 0x403   :  { %v704_v20 = vrot.slane %v697_v19, %v2836_v50 }
 0x405   :  { %v706_v21 = vunpack.i.h.s16 %v704_v20  ;;  %v2035_v22 = vpack.i.b16 %v704_v20, %v704_v20 }
 0x407   :  { %v708_v24 = vpack.i.b16 %v706_v21, %v706_v21  ;;  %v715_v25 = vrot.slane %v2035_v22, %v2840_v56 }
 0x409   :  { %v722_v27 = vrot.slane %v708_v24, %v2840_v56  ;;  %v729_v28 = vsel %vm727_vm15, %v715_v25, %v728_v23  ;;  %v2608_v23 = vld [vmem:[%s3220_s1 + $0x140] sm:$0xff]   ;;  %v2609_v25 = vld [vmem:[%s3220_s1 + $0x148] sm:$0xff]  }
 0x40a   :  { %730 = vst [vmem:[#allocation2] sm:$0x2] %v729_v28  ;;  %v2612_v28 = vld [vmem:[%s3220_s1 + $0x160] sm:$0xff]  }
 0x40b   :  { %v732_v30 = vsel %vm727_vm15, %v722_v27, %v731_v26  ;;  %v2610_v26 = vld [vmem:[%s3220_s1 + $0x150] sm:$0xff]   ;;  %v2611_v27 = vld [vmem:[%s3220_s1 + $0x158] sm:$0xff]  }
 0x40c   :  { %733 = vst [vmem:[#allocation2 + $0x4] sm:$0x2] %v732_v30  ;;  %v843_v31 = vpop.f32.mrb[12].mxu1  ;;  %v2614_v30 = vld [vmem:[%s3220_s1 + $0x170] sm:$0xff]  }
 0x40d   :  { %v844_v32 = vadd.f32 %v2054_v29, %v843_v31  ;;  %v2429_v33 = vpop.f32.mrb[13].mxu1  ;;  %v2613_v29 = vld [vmem:[%s3220_s1 + $0x168] sm:$0xff]   ;;  %v2615_v31 = vld [vmem:[%s3220_s1 + $0x178] sm:$0xff]  }
 0x40e   :  { %v846_v34 = vpop.f32.mrb[14].mxu1  ;;  %v2616_v33 = vld [vmem:[%s3222_s3 + $0x50] sm:$0xff]  }
 0x40f   :  { %v850_v35 = vmul.f32 1.442695, %v844_v32  ;;  %v2430_v36 = vpop.f32.mrb[15].mxu1  ;;  %vm849_vm1 = vcmp.gt.f32.partialorder %v844_v32, 0.0  ;;  %v2617_v34 = vld [vmem:[%s3222_s3 + $0x58] sm:$0xff]  }
 0x411   :  { %2650 = vpow2.f32 %v850_v35  ;;  %v966_v8 = vld [vmem:[#allocation2] sm:$0x2]  ;;  %v2108_v35 = vld [vmem:[%s3223_s4 + $0x4] ss:$0 sm:$0xff] }
 0x413   :  { %v969_v11 = vld [vmem:[#allocation2 + $0x4] sm:$0x2] }
 0x41b   :  { %v2651_v37 = vpop.eup %2650 }
 0x41c   :  { %v2063_v38 = vadd.f32 -1.0, %v2651_v37 }
 0x41e   :  { %v853_v39 = vsel %vm849_vm1, %v844_v32, %v2063_v38  ;;  %v2114_v32 = vld [vmem:[%s3219_s0 + $0x5] sm:$0x1]  ;;  %vm1679_vm1 = vcmask 257027  }
 0x41f   :  { %v854_v41 = vpack.c.bf16 %v853_v39, %v853_v39 }
 0x421   :  { %2436 = vmatmul.mubr.msk.bf16.vlgmr.msra.gmra.mrb[12].mxu0 %vm163_vm2, %v854_v41 }
 0x422   :  { %2440 = vmatpush3.bf16.msra.mxu0 %v2598_v40  ;;  %2455 = vmatprep.mubr.msk.bf16.mxu0 %vm2695_vm0, %v2694_v1 }
 0x423   :  { %2441 = vmatprep.subr.bf16.mxu0 %v2694_v1 }
 0x426   :  { %2442 = vmatpush3.bf16.msra.mxu0 %v2599_v42 }
 0x427   :  { %2443 = vmatprep.subr.bf16.mxu0 %v2694_v1 }
 0x42a   :  { %2444 = vmatpush3.bf16.msra.mxu0 %v2600_v43 }
 0x42b   :  { %2445 = vmatprep.subr.bf16.mxu0 %v2694_v1 }
 0x42e   :  { %2446 = vmatpush3.bf16.msra.mxu0 %v2601_v44 }
 0x42f   :  { %2447 = vmatprep.subr.bf16.mxu0 %v2694_v1 }
 0x432   :  { %2448 = vmatpush3.bf16.msra.mxu0 %v2602_v45 }
 0x433   :  { %2449 = vmatprep.subr.bf16.mxu0 %v2694_v1 }
 0x436   :  { %2450 = vmatpush3.bf16.msra.mxu0 %v2603_v46 }
 0x437   :  { %2451 = vmatprep.subr.bf16.mxu0 %v2694_v1 }
 0x43a   :  { %2452 = vmatpush3.bf16.msra.mxu0 %v2604_v47 }
 0x43b   :  { %2453 = vmatprep.subr.bf16.mxu0 %v2694_v1 }
 0x43e   :  { %2454 = vmatpush3.bf16.msra.mxu0 %v2605_v48 }
 0x43f   :  { %2487 = vmatprep.subr.bf16.mxu0 %v2694_v1 }
 0x441   :  { %2456 = vmatmul.mubr.bf16.vlgmr.msra.gmra.mrb[16].mxu0 %v2075_v49 }
 0x442   :  { %2491 = vmatprep.mubr.msk.bf16.mxu0 %vm2695_vm0, %v2694_v1  ;;  %2488 = vmatpush3.bf16.msra.mxu0 %v2616_v33 }
 0x443   :  { %2489 = vmatprep.subr.bf16.mxu0 %v2694_v1 }
 0x446   :  { %2490 = vmatpush3.bf16.msra.mxu0 %v2617_v34 }
 0x447   :  { %2495 = vmatprep.subr.bf16.mxu0 %v2694_v1 }
 0x4f4   :  { %v917_v54 = vpop.f32.mrb[12].mxu0 }
 0x4f5   :  { %v918_v55 = vadd.f32 %v2069_v53, %v917_v54  ;;  %v2437_v57 = vpop.f32.mrb[13].mxu0  ;;  %v1208_v54 = vld [vmem:[#allocation2 + $0x4] sm:$0x4] }
 0x4f6   :  { %v920_v58 = vpop.f32.mrb[14].mxu0 }
 0x4f7   :  { %v924_v59 = vmul.f32 1.442695, %v918_v55  ;;  %v2438_v60 = vpop.f32.mrb[15].mxu0  ;;  %vm923_vm3 = vcmp.gt.f32.partialorder %v918_v55, 0.0  ;;  %v2132_v58 = vld [vmem:[%s3221_s2 + $0x5] ss:$0 sm:$0xff] }
 0x4f9   :  { %2652 = vpow2.f32 %v924_v59 }
 0x503   :  { %v2653_v61 = vpop.eup %2652 }
 0x504   :  { %v2073_v62 = vadd.f32 -1.0, %v2653_v61 }
 0x506   :  { %v927_v63 = vsel %vm923_vm3, %v918_v55, %v2073_v62  ;;  %vm1680_vm3 = vsmask.f32 3328 }
 0x507   :  { %v928_v0 = vpack.c.bf16 %v927_v63, %v927_v63  ;;  %vm1681_vm4 = vmand %vm1679_vm1, %vm1680_vm3 }
 0x509   :  { %v936_v2 = vrot.slane %v928_v0, %v2836_v50 }
 0x50b   :  { %v943_v3 = vrot.slane %v936_v2, %v2836_v50 }
 0x50d   :  { %v945_v4 = vunpack.i.h.s16 %v943_v3  ;;  %v2074_v5 = vpack.i.b16 %v943_v3, %v943_v3 }
 0x50f   :  { %v947_v6 = vpack.i.b16 %v945_v4, %v945_v4  ;;  %v954_v7 = vrot.slane %v2074_v5, %v2840_v56 }
 0x511   :  { %v961_v9 = vrot.slane %v947_v6, %v2840_v56  ;;  %v967_v10 = vsel %vm965_vm5, %v954_v7, %v966_v8  ;;  %v2618_v6 = vld [vmem:[%s3220_s1 + $0x180] sm:$0xff]   ;;  %v2619_v8 = vld [vmem:[%s3220_s1 + $0x188] sm:$0xff]  }
 0x512   :  { %968 = vst [vmem:[#allocation2] sm:$0x2] %v967_v10  ;;  %v2621_v10 = vld [vmem:[%s3220_s1 + $0x198] sm:$0xff]  }
 0x513   :  { %v970_v13 = vsel %vm965_vm5, %v961_v9, %v969_v11  ;;  %v2620_v9 = vld [vmem:[%s3220_s1 + $0x190] sm:$0xff]   ;;  %v2622_v11 = vld [vmem:[%s3220_s1 + $0x1a0] sm:$0xff]  }
 0x514   :  { %971 = vst [vmem:[#allocation2 + $0x4] sm:$0x2] %v970_v13  ;;  %v1081_v14 = vpop.f32.mrb[16].mxu0  ;;  %v2624_v13 = vld [vmem:[%s3220_s1 + $0x1b0] sm:$0xff]  }
 0x515   :  { %v1082_v15 = vadd.f32 %v2093_v12, %v1081_v14  ;;  %v2457_v16 = vpop.f32.mrb[17].mxu0  ;;  %v2623_v12 = vld [vmem:[%s3220_s1 + $0x1a8] sm:$0xff]   ;;  %v2625_v14 = vld [vmem:[%s3220_s1 + $0x1b8] sm:$0xff]  }
 0x516   :  { %v1084_v17 = vpop.f32.mrb[18].mxu0  ;;  %v2626_v16 = vld [vmem:[%s3222_s3 + $0x60] sm:$0xff]  }
 0x517   :  { %v1088_v18 = vmul.f32 1.442695, %v1082_v15  ;;  %v2458_v19 = vpop.f32.mrb[19].mxu0  ;;  %vm1087_vm6 = vcmp.gt.f32.partialorder %v1082_v15, 0.0  ;;  %v2627_v17 = vld [vmem:[%s3222_s3 + $0x68] sm:$0xff]  }
 0x519   :  { %2654 = vpow2.f32 %v1088_v18  ;;  %v2147_v18 = vld [vmem:[%s3223_s4 + $0x5] ss:$0 sm:$0xff] }
 0x523   :  { %v2655_v20 = vpop.eup %2654 }
 0x524   :  { %v2102_v21 = vadd.f32 -1.0, %v2655_v20 }
 0x526   :  { %v1091_v22 = vsel %vm1087_vm6, %v1082_v15, %v2102_v21  ;;  %v2153_v15 = vld [vmem:[%s3219_s0 + $0x6] sm:$0x1] }
 0x527   :  { %v1092_v24 = vpack.c.bf16 %v1091_v22, %v1091_v22 }
 0x529   :  { %2464 = vmatmul.mubr.msk.bf16.vlgmr.msra.gmra.mrb[16].mxu1 %vm163_vm2, %v1092_v24 }
 0x52a   :  { %2468 = vmatpush3.bf16.msra.mxu1 %v2608_v23  ;;  %2483 = vmatprep.mubr.msk.bf16.mxu1 %vm2695_vm0, %v2694_v1 }
 0x52b   :  { %2469 = vmatprep.subr.bf16.mxu1 %v2694_v1 }
 0x52e   :  { %2470 = vmatpush3.bf16.msra.mxu1 %v2609_v25 }
 0x52f   :  { %2471 = vmatprep.subr.bf16.mxu1 %v2694_v1 }
 0x532   :  { %2472 = vmatpush3.bf16.msra.mxu1 %v2610_v26 }
 0x533   :  { %2473 = vmatprep.subr.bf16.mxu1 %v2694_v1 }
 0x536   :  { %2474 = vmatpush3.bf16.msra.mxu1 %v2611_v27 }
 0x537   :  { %2475 = vmatprep.subr.bf16.mxu1 %v2694_v1 }
 0x53a   :  { %2476 = vmatpush3.bf16.msra.mxu1 %v2612_v28 }
 0x53b   :  { %2477 = vmatprep.subr.bf16.mxu1 %v2694_v1 }
 0x53e   :  { %2478 = vmatpush3.bf16.msra.mxu1 %v2613_v29 }
 0x53f   :  { %2479 = vmatprep.subr.bf16.mxu1 %v2694_v1 }
 0x542   :  { %2480 = vmatpush3.bf16.msra.mxu1 %v2614_v30 }
 0x543   :  { %2481 = vmatprep.subr.bf16.mxu1 %v2694_v1 }
 0x546   :  { %2482 = vmatpush3.bf16.msra.mxu1 %v2615_v31 }
 0x547   :  { %2515 = vmatprep.subr.bf16.mxu1 %v2694_v1 }
 0x549   :  { %2484 = vmatmul.mubr.bf16.vlgmr.msra.gmra.mrb[20].mxu1 %v2114_v32 }
 0x54a   :  { %2519 = vmatprep.mubr.msk.bf16.mxu1 %vm2695_vm0, %v2694_v1  ;;  %2516 = vmatpush3.bf16.msra.mxu1 %v2626_v16 }
 0x54b   :  { %2517 = vmatprep.subr.bf16.mxu1 %v2694_v1 }
 0x54e   :  { %2518 = vmatpush3.bf16.msra.mxu1 %v2627_v17 }
 0x54f   :  { %2523 = vmatprep.subr.bf16.mxu1 %v2694_v1 }
 0x5fc   :  { %v1155_v36 = vpop.f32.mrb[16].mxu1 }
 0x5fd   :  { %v1156_v37 = vadd.f32 %v2108_v35, %v1155_v36  ;;  %v2465_v38 = vpop.f32.mrb[17].mxu1 }
 0x5fe   :  { %v1158_v39 = vpop.f32.mrb[18].mxu1 }
 0x5ff   :  { %v1162_v40 = vmul.f32 1.442695, %v1156_v37  ;;  %v2466_v41 = vpop.f32.mrb[19].mxu1  ;;  %vm1161_vm7 = vcmp.gt.f32.partialorder %v1156_v37, 0.0  ;;  %v2171_v39 = vld [vmem:[%s3221_s2 + $0x6] ss:$0 sm:$0xff] }
 0x601   :  { %2656 = vpow2.f32 %v1162_v40 }
 0x60b   :  { %v2657_v42 = vpop.eup %2656 }
 0x60c   :  { %v2112_v43 = vadd.f32 -1.0, %v2657_v42 }
 0x60e   :  { %v1165_v44 = vsel %vm1161_vm7, %v1156_v37, %v2112_v43 }
 0x60f   :  { %v1166_v45 = vpack.c.bf16 %v1165_v44, %v1165_v44 }
 0x611   :  { %v1174_v46 = vrot.slane %v1166_v45, %v2836_v50 }
 0x613   :  { %v1181_v47 = vrot.slane %v1174_v46, %v2836_v50 }
 0x615   :  { %v1183_v48 = vunpack.i.h.s16 %v1181_v47  ;;  %v2113_v49 = vpack.i.b16 %v1181_v47, %v1181_v47 }
 0x617   :  { %v1185_v52 = vpack.i.b16 %v1183_v48, %v1183_v48  ;;  %v1192_v53 = vrot.slane %v2113_v49, %v2840_v56 }
 0x619   :  { %v1199_v55 = vrot.slane %v1185_v52, %v2840_v56  ;;  %v1206_v57 = vsel %vm1204_vm10, %v1192_v53, %v1205_v51  ;;  %v2628_v51 = vld [vmem:[%s3220_s1 + $0x1c0] sm:$0xff]   ;;  %v2629_v53 = vld [vmem:[%s3220_s1 + $0x1c8] sm:$0xff]  }
 0x61a   :  { %1207 = vst [vmem:[#allocation2] sm:$0x4] %v1206_v57  ;;  %v2632_v57 = vld [vmem:[%s3220_s1 + $0x1e0] sm:$0xff]  }
 0x61b   :  { %v1209_v59 = vsel %vm1204_vm10, %v1199_v55, %v1208_v54  ;;  %v2630_v54 = vld [vmem:[%s3220_s1 + $0x1d0] sm:$0xff]   ;;  %v2631_v55 = vld [vmem:[%s3220_s1 + $0x1d8] sm:$0xff]  }
 0x61c   :  { %1210 = vst [vmem:[#allocation2 + $0x4] sm:$0x4] %v1209_v59  ;;  %v1320_v60 = vpop.f32.mrb[20].mxu1  ;;  %v2634_v59 = vld [vmem:[%s3220_s1 + $0x1f0] sm:$0xff]  }
 0x61d   :  { %v1321_v61 = vadd.f32 %v2132_v58, %v1320_v60  ;;  %v2485_v62 = vpop.f32.mrb[21].mxu1  ;;  %v2633_v58 = vld [vmem:[%s3220_s1 + $0x1e8] sm:$0xff]   ;;  %v2635_v60 = vld [vmem:[%s3220_s1 + $0x1f8] sm:$0xff]  }
 0x61e   :  { %v1323_v63 = vpop.f32.mrb[22].mxu1  ;;  %v2636_v62 = vld [vmem:[%s3222_s3 + $0x70] sm:$0xff]  }
 0x61f   :  { %v1327_v0 = vmul.f32 1.442695, %v1321_v61  ;;  %v2486_v2 = vpop.f32.mrb[23].mxu1  ;;  %vm1326_vm11 = vcmp.gt.f32.partialorder %v1321_v61, 0.0  ;;  %v2637_v63 = vld [vmem:[%s3222_s3 + $0x78] sm:$0xff]  }
 0x621   :  { %2658 = vpow2.f32 %v1327_v0  ;;  %v1443_v35 = vld [vmem:[#allocation2] sm:$0x4]  ;;  %v2186_v0 = vld [vmem:[%s3223_s4 + $0x6] ss:$0 sm:$0xff] }
 0x623   :  { %v1446_v38 = vld [vmem:[#allocation2 + $0x4] sm:$0x4] }
 0x62b   :  { %v2659_v3 = vpop.eup %2658 }
 0x62c   :  { %v2141_v4 = vadd.f32 -1.0, %v2659_v3 }
 0x62e   :  { %v1330_v5 = vsel %vm1326_vm11, %v1321_v61, %v2141_v4  ;;  %v2192_v61 = vld [vmem:[%s3219_s0 + $0x7] sm:$0x1] }
 0x62f   :  { %v1331_v7 = vpack.c.bf16 %v1330_v5, %v1330_v5 }
 0x631   :  { %2492 = vmatmul.mubr.msk.bf16.vlgmr.msra.gmra.mrb[20].mxu0 %vm163_vm2, %v1331_v7 }
 0x632   :  { %2496 = vmatpush3.bf16.msra.mxu0 %v2618_v6  ;;  %2511 = vmatprep.mubr.msk.bf16.mxu0 %vm2695_vm0, %v2694_v1 }
 0x633   :  { %2497 = vmatprep.subr.bf16.mxu0 %v2694_v1 }
 0x636   :  { %2498 = vmatpush3.bf16.msra.mxu0 %v2619_v8 }
 0x637   :  { %2499 = vmatprep.subr.bf16.mxu0 %v2694_v1 }
 0x63a   :  { %2500 = vmatpush3.bf16.msra.mxu0 %v2620_v9 }
 0x63b   :  { %2501 = vmatprep.subr.bf16.mxu0 %v2694_v1 }
 0x63e   :  { %2502 = vmatpush3.bf16.msra.mxu0 %v2621_v10 }
 0x63f   :  { %2503 = vmatprep.subr.bf16.mxu0 %v2694_v1 }
 0x642   :  { %2504 = vmatpush3.bf16.msra.mxu0 %v2622_v11 }
 0x643   :  { %2505 = vmatprep.subr.bf16.mxu0 %v2694_v1 }
 0x646   :  { %2506 = vmatpush3.bf16.msra.mxu0 %v2623_v12 }
 0x647   :  { %2507 = vmatprep.subr.bf16.mxu0 %v2694_v1 }
 0x64a   :  { %2508 = vmatpush3.bf16.msra.mxu0 %v2624_v13 }
 0x64b   :  { %2509 = vmatprep.subr.bf16.mxu0 %v2694_v1 }
 0x64e   :  { %2510 = vmatpush3.bf16.msra.mxu0 %v2625_v14 }
 0x64f   :  { %2543 = vmatprep.subr.bf16.mxu0 %v2694_v1 }
 0x651   :  { %2512 = vmatmul.mubr.bf16.vlgmr.msra.gmra.mrb[24].mxu0 %v2153_v15  ;;  %v1682_v15 = vld [vmem:[#allocation2] sm:$0x8] }
 0x652   :  { %2547 = vmatprep.mubr.msk.bf16.mxu0 %vm2695_vm0, %v2694_v1  ;;  %2544 = vmatpush3.bf16.msra.mxu0 %v2636_v62 }
 0x653   :  { %2545 = vmatprep.subr.bf16.mxu0 %v2694_v1 }
 0x656   :  { %2546 = vmatpush3.bf16.msra.mxu0 %v2637_v63 }
 0x704   :  { %v1394_v19 = vpop.f32.mrb[20].mxu0 }
 0x705   :  { %v1395_v20 = vadd.f32 %v2147_v18, %v1394_v19  ;;  %v2493_v21 = vpop.f32.mrb[21].mxu0  ;;  %v1685_v18 = vld [vmem:[#allocation2 + $0x4] sm:$0x8] }
 0x706   :  { %v1397_v22 = vpop.f32.mrb[22].mxu0  ;;  %v2210_v21 = vld [vmem:[%s3221_s2 + $0x7] ss:$0 sm:$0xff]  ;;  %s2698_s2 = smov [#allocation2]  }
 0x707   :  { %v1401_v23 = vmul.f32 1.442695, %v1395_v20  ;;  %v2494_v24 = vpop.f32.mrb[23].mxu0  ;;  %vm1400_vm12 = vcmp.gt.f32.partialorder %v1395_v20, 0.0 }
 0x709   :  { %2660 = vpow2.f32 %v1401_v23 }
 0x713   :  { %v2661_v25 = vpop.eup %2660 }
 0x714   :  { %v2151_v26 = vadd.f32 -1.0, %v2661_v25 }
 0x716   :  { %v1404_v27 = vsel %vm1400_vm12, %v1395_v20, %v2151_v26 }
 0x717   :  { %v1405_v28 = vpack.c.bf16 %v1404_v27, %v1404_v27 }
 0x719   :  { %v1413_v29 = vrot.slane %v1405_v28, %v2836_v50 }
 0x71b   :  { %v1420_v30 = vrot.slane %v1413_v29, %v2836_v50 }
 0x71d   :  { %v1422_v31 = vunpack.i.h.s16 %v1420_v30  ;;  %v2152_v32 = vpack.i.b16 %v1420_v30, %v1420_v30 }
 0x71f   :  { %v1424_v33 = vpack.i.b16 %v1422_v31, %v1422_v31  ;;  %v1431_v34 = vrot.slane %v2152_v32, %v2840_v56 }
 0x721   :  { %v1438_v36 = vrot.slane %v1424_v33, %v2840_v56  ;;  %v1444_v37 = vsel %vm1442_vm14, %v1431_v34, %v1443_v35  ;;  %v2225_v33 = vld [vmem:[%s3223_s4 + $0x7] ss:$0 sm:$0xff]  ;;  %s1931_s4 = sshll.u32 %s2698_s2, 4  ;;  %s1932_s4 = int_to_ptr.vmem [resolvable:$true] %s1931_s4 }
 0x722   :  { %1445 = vst [vmem:[#allocation2] sm:$0x4] %v1444_v37  ;;  %s2670_s23 = scalar_lea.vmem %s1932_s4, 128  ;;  %p2675_p1 = scmp.lt.s32.totalorder %s1932_s4, %s1932_s4 }
 0x723   :  { %v1447_v40 = vsel %vm1442_vm14, %v1438_v36, %v1446_v38  ;;  %p2671_p0 = scmp.ne.s32.totalorder %s1932_s4, %s2670_s23  ;;  %p2676_p2 = scmp.lt.s32.totalorder %s2670_s23, %s2670_s23 }
 0x724   :  { %1448 = vst [vmem:[#allocation2 + $0x4] sm:$0x4] %v1447_v40  ;;  %v1558_v41 = vpop.f32.mrb[24].mxu0 }
 0x725   :  { %v1559_v42 = vadd.f32 %v2171_v39, %v1558_v41  ;;  %v2513_v43 = vpop.f32.mrb[25].mxu0  ;;  %p2677_p3 = por %p2676_p2, %p2675_p1 }
 0x726   :  { %v1561_v44 = vpop.f32.mrb[26].mxu0 }
 0x727   :  { %v1565_v45 = vmul.f32 1.442695, %v1559_v42  ;;  %v2514_v46 = vpop.f32.mrb[27].mxu0  ;;  %vm1564_vm15 = vcmp.gt.f32.partialorder %v1559_v42, 0.0  ;;  %p2678_p4 = pnand %p2677_p3, %p2671_p0 }
 0x729   :  { %2662 = vpow2.f32 %v1565_v45 }
 0x733   :  { %v2663_v47 = vpop.eup %2662 }
 0x734   :  { %v2180_v48 = vadd.f32 -1.0, %v2663_v47 }
 0x736   :  { %v1568_v49 = vsel %vm1564_vm15, %v1559_v42, %v2180_v48 }
 0x737   :  { %v1569_v52 = vpack.c.bf16 %v1568_v49, %v1568_v49 }
 0x739   :  { %2520 = vmatmul.mubr.msk.bf16.vlgmr.msra.gmra.mrb[24].mxu1 %vm163_vm2, %v1569_v52 }
 0x73a   :  { %2524 = vmatpush3.bf16.msra.mxu1 %v2628_v51  ;;  %2539 = vmatprep.mubr.msk.bf16.mxu1 %vm2695_vm0, %v2694_v1 }
 0x73b   :  { %2525 = vmatprep.subr.bf16.mxu1 %v2694_v1 }
 0x73e   :  { %2526 = vmatpush3.bf16.msra.mxu1 %v2629_v53 }
 0x73f   :  { %2527 = vmatprep.subr.bf16.mxu1 %v2694_v1 }
 0x742   :  { %2528 = vmatpush3.bf16.msra.mxu1 %v2630_v54 }
 0x743   :  { %2529 = vmatprep.subr.bf16.mxu1 %v2694_v1 }
 0x746   :  { %2530 = vmatpush3.bf16.msra.mxu1 %v2631_v55 }
 0x747   :  { %2531 = vmatprep.subr.bf16.mxu1 %v2694_v1 }
 0x74a   :  { %2532 = vmatpush3.bf16.msra.mxu1 %v2632_v57 }
 0x74b   :  { %2533 = vmatprep.subr.bf16.mxu1 %v2694_v1 }
 0x74e   :  { %2534 = vmatpush3.bf16.msra.mxu1 %v2633_v58 }
 0x74f   :  { %2535 = vmatprep.subr.bf16.mxu1 %v2694_v1 }
 0x752   :  { %2536 = vmatpush3.bf16.msra.mxu1 %v2634_v59 }
 0x753   :  { %2537 = vmatprep.subr.bf16.mxu1 %v2694_v1 }
 0x756   :  { %2538 = vmatpush3.bf16.msra.mxu1 %v2635_v60 }
 0x759   :  { %2540 = vmatmul.mubr.bf16.vlgmr.msra.gmra.mrb[28].mxu1 %v2192_v61 }
 0x80c   :  { %v1632_v2 = vpop.f32.mrb[24].mxu1 }
 0x80d   :  { %v1633_v3 = vadd.f32 %v2186_v0, %v1632_v2  ;;  %v2521_v4 = vpop.f32.mrb[25].mxu1 }
 0x80e   :  { %v1635_v5 = vpop.f32.mrb[26].mxu1 }
 0x80f   :  { %v1639_v6 = vmul.f32 1.442695, %v1633_v3  ;;  %v2522_v7 = vpop.f32.mrb[27].mxu1  ;;  %vm1638_vm0 = vcmp.gt.f32.partialorder %v1633_v3, 0.0 }
 0x811   :  { %2664 = vpow2.f32 %v1639_v6 }
 0x81b   :  { %v2665_v8 = vpop.eup %2664 }
 0x81c   :  { %v2190_v9 = vadd.f32 -1.0, %v2665_v8 }
 0x81e   :  { %v1642_v1 = vsel %vm1638_vm0, %v1633_v3, %v2190_v9 }
 0x81f   :  { %v1643_v10 = vpack.c.bf16 %v1642_v1, %v1642_v1 }
 0x821   :  { %v1651_v11 = vrot.slane %v1643_v10, %v2836_v50 }
 0x823   :  { %v1658_v12 = vrot.slane %v1651_v11, %v2836_v50 }
 0x825   :  { %v1660_v13 = vunpack.i.h.s16 %v1658_v12  ;;  %v2191_v14 = vpack.i.b16 %v1658_v12, %v1658_v12 }
 0x827   :  { %v1662_v16 = vpack.i.b16 %v1660_v13, %v1660_v13  ;;  %v1669_v17 = vrot.slane %v2191_v14, %v2840_v56 }
 0x829   :  { %v1676_v19 = vrot.slane %v1662_v16, %v2840_v56  ;;  %v1683_v20 = vsel %vm1681_vm4, %v1669_v17, %v1682_v15 }
 0x82a   :  { %1684 = vst [vmem:[#allocation2] sm:$0x8] %v1683_v20 }
 0x82b   :  { %v1686_v22 = vsel %vm1681_vm4, %v1676_v19, %v1685_v18 }
 0x82c   :  { %1687 = vst [vmem:[#allocation2 + $0x4] sm:$0x8] %v1686_v22  ;;  %v1797_v23 = vpop.f32.mrb[28].mxu1 }
 0x82d   :  { %v1798_v24 = vadd.f32 %v2210_v21, %v1797_v23  ;;  %v2541_v25 = vpop.f32.mrb[29].mxu1 }
 0x82e   :  { %v1800_v26 = vpop.f32.mrb[30].mxu1 }
 0x82f   :  { %v1804_v27 = vmul.f32 1.442695, %v1798_v24  ;;  %v2542_v28 = vpop.f32.mrb[31].mxu1  ;;  %vm1803_vm5 = vcmp.gt.f32.partialorder %v1798_v24, 0.0 }
 0x831   :  { %2666 = vpow2.f32 %v1804_v27  ;;  %v1920_v51 = vld [vmem:[#allocation2] sm:$0x8] }
 0x833   :  { %v1923_v54 = vld [vmem:[#allocation2 + $0x4] sm:$0x8] }
 0x83b   :  { %v2667_v29 = vpop.eup %2666 }
 0x83c   :  { %v2219_v30 = vadd.f32 -1.0, %v2667_v29 }
 0x83e   :  { %v1807_v31 = vsel %vm1803_vm5, %v1798_v24, %v2219_v30 }
 0x83f   :  { %v1808_v32 = vpack.c.bf16 %v1807_v31, %v1807_v31 }
 0x841   :  { %2548 = vmatmul.mubr.msk.bf16.vlgmr.msra.gmra.mrb[28].mxu0 %vm163_vm2, %v1808_v32  ;;  %vm1918_vm2 = vsmask.f32 7950 }
 0x842   :  { %vm1919_vm7 = vmand %vm1679_vm1, %vm1918_vm2 }
 0x914   :  { %v1871_v34 = vpop.f32.mrb[28].mxu0 }
 0x915   :  { %v1872_v35 = vadd.f32 %v2225_v33, %v1871_v34  ;;  %v2549_v36 = vpop.f32.mrb[29].mxu0 }
 0x916   :  { %v1874_v37 = vpop.f32.mrb[30].mxu0 }
 0x917   :  { %v1878_v38 = vmul.f32 1.442695, %v1872_v35  ;;  %v2550_v39 = vpop.f32.mrb[31].mxu0  ;;  %vm1877_vm6 = vcmp.gt.f32.partialorder %v1872_v35, 0.0 }
 0x919   :  { %2668 = vpow2.f32 %v1878_v38 }
 0x923   :  { %v2669_v40 = vpop.eup %2668 }
 0x924   :  { %v2229_v41 = vadd.f32 -1.0, %v2669_v40 }
 0x926   :  { %v1881_v42 = vsel %vm1877_vm6, %v1872_v35, %v2229_v41 }
 0x927   :  { %v1882_v43 = vpack.c.bf16 %v1881_v42, %v1881_v42 }
 0x929   :  { %v1890_v44 = vrot.slane %v1882_v43, %v2836_v50 }
 0x92b   :  { %v1897_v45 = vrot.slane %v1890_v44, %v2836_v50 }
 0x92d   :  { %v1899_v46 = vunpack.i.h.s16 %v1897_v45  ;;  %v2230_v47 = vpack.i.b16 %v1897_v45, %v1897_v45 }
 0x92f   :  { %v1901_v48 = vpack.i.b16 %v1899_v46, %v1899_v46  ;;  %v1908_v49 = vrot.slane %v2230_v47, %v2840_v56 }
 0x931   :  { %v1915_v52 = vrot.slane %v1901_v48, %v2840_v56  ;;  %v1921_v53 = vsel %vm1919_vm7, %v1908_v49, %v1920_v51 }
 0x932   :  { %1922 = vst [vmem:[#allocation2] sm:$0x8] %v1921_v53 }
 0x933   :  { %v1924_v55 = vsel %vm1919_vm7, %v1915_v52, %v1923_v54 }
 0x934   :  { %1925 = vst [vmem:[#allocation2 + $0x4] sm:$0x8] %v1924_v55 }
 0x935   :  { %2681 = shalt.err (!%p2678_p4)
}
 0x936   :  { %s2682_s26 = scalar_lea.hbm %s3224_s5, 128 }
 0x937   :  { %p2683_p5 = scmp.ne.s32.totalorder %s3224_s5, %s2682_s26  ;;  %p2686_p6 = scmp.lt.u32.totalorder %s2682_s26, %s3224_s5 }
 0x939   :  { %p2688_p7 = pnand %p2686_p6, %p2683_p5 }
 0x93b   :  { %2691 = shalt.err (!%p2688_p7)
}
 0x93c   :  { %s2699_s6 = smov 64   ;;  %s2700_s7 = smov 4  }
 0x93d   :  { %1937 = dma.vmem_to_hbm [thread:$0]  %s1932_s4, 128, %s3224_s5, [#allocation3], %s2699_s6, %s2699_s6, %s2700_s7  }
 0x93e   :  { %2692 = dma.done.wait [#allocation3], 128  }
 0x93f   :  { %2693 = vsyncadd [#allocation3], 4294967168 }
 0x940   :  { %1941 = vsyncpa [#allocation3], 1 }

</bundles_post_ra>
